<compile_context>
chip_gen: v7x
topology: tpu7x:2x2x1
jax: 0.10.0
libtpu: 0.0.40
codegen_flags: <defaults>
</compile_context>

<pallas_src>
import math
from functools import partial

import jax
import jax.numpy as jnp
from jax import lax
from jax.experimental import pallas as pl
from jax.experimental.pallas import tpu as pltpu

EPS_LN = 1e-5    # F.layer_norm default eps
EPS_L2 = 1e-12   # guard against a zero row in the L2 normalization


def _block_kernel(num_heads,
                  x_ref,
                  wq_ref, bq_ref, wkv_ref, bkv_ref,
                  wo_ref, bo_ref,
                  w1_ref, b1_ref, w2_ref, b2_ref,
                  alpha_a_ref, alpha_m_ref,
                  out_ref,
                  attn_scratch):
    f32 = jnp.float32
    S, E = x_ref.shape
    tq = out_ref.shape[0]
    H = num_heads
    hd = E // H
    cdt = wq_ref.dtype                     # MXU compute dtype (bf16)

    qi = pl.program_id(1)
    row_start = pl.multiple_of(qi * tq, 8)

    # Residual stream for this query tile (kept in f32) and full sequence for K/V.
    h = x_ref[pl.ds(row_start, tq), :].astype(f32)     # (tq, E)
    x_all = x_ref[...].astype(f32)                     # (S, E)

    def layernorm(t):
        mu = jnp.mean(t, axis=-1, keepdims=True)
        var = jnp.mean(jnp.square(t - mu), axis=-1, keepdims=True)
        return (t - mu) * lax.rsqrt(var + EPS_LN)

    def l2norm(t):
        # L2Norm() is not defined in the reference source; standard nGPT-style
        # normalization x / ||x||_2 along the embed axis (eps-guarded).
        return t * lax.rsqrt(jnp.sum(t * t, axis=-1, keepdims=True) + EPS_L2)

    # ---------------- attention block ----------------
    xn_q = layernorm(h).astype(cdt)                    # (tq, E) for Q
    xn_all = layernorm(x_all).astype(cdt)              # (S, E)  for K/V

    # Fused projections (double projection + 1/sqrt(hd) scale folded offline).
    q = jnp.dot(xn_q, wq_ref[...], preferred_element_type=f32) + bq_ref[...]        # (tq, E)
    kv = jnp.dot(xn_all, wkv_ref[...], preferred_element_type=f32) + bkv_ref[...]   # (S, 2E)
    k = kv[:, :E]
    v = kv[:, E:]

    # Causal mask for this query tile: key index > global query index is masked.
    qidx = row_start + lax.broadcasted_iota(jnp.int32, (tq, S), 0)
    kidx = lax.broadcasted_iota(jnp.int32, (tq, S), 1)
    causal = kidx > qidx                               # (tq, S)

    # Per-head attention, each head's output written directly into a VMEM slab
    # (no lane-axis concatenate, per-head buffers consumed immediately).
    for hh in range(H):
        sl = slice(hh * hd, (hh + 1) * hd)
        qh = q[:, sl].astype(cdt)                      # (tq, hd) — scale already folded in
        kh = k[:, sl].astype(cdt)                      # (S, hd)
        vh = v[:, sl].astype(cdt)                      # (S, hd)
        s = jnp.dot(qh, kh.T, preferred_element_type=f32)       # (tq, S)
        s = jnp.where(causal, -jnp.inf, s)
        p = jnp.exp(s - jnp.max(s, axis=-1, keepdims=True))
        l = jnp.sum(p, axis=-1, keepdims=True)                  # (tq, 1)
        o = jnp.dot(p.astype(cdt), vh, preferred_element_type=f32)   # (tq, hd)
        # deferred softmax normalization on the small (tq, hd) output, via EUP reciprocal
        attn_scratch[:, sl] = o * pl.reciprocal(l, approx=True)

    attn = attn_scratch[...].astype(cdt)
    attn = jnp.dot(attn, wo_ref[...], preferred_element_type=f32) + bo_ref[...]     # out_proj

    alpha_a = alpha_a_ref[...]                         # (1, E) broadcasts over rows
    alpha_m = alpha_m_ref[...]

    h_A = l2norm(attn)
    h1 = l2norm(h + alpha_a * (h_A - h))

    # ---------------- MLP block ----------------
    # TODO(synk): nn.Dropout is identity at inference; training-mode dropout not modeled.
    m = jnp.maximum(
        jnp.dot(h1.astype(cdt), w1_ref[...], preferred_element_type=f32) + b1_ref[...], 0.0)
    y = jnp.dot(m.astype(cdt), w2_ref[...], preferred_element_type=f32) + b2_ref[...]
    h_M = l2norm(y)
    h2 = l2norm(h1 + alpha_m * (h_M - h1))

    out_ref[...] = h2.astype(out_ref.dtype)


def fuse_params(params, num_heads, compute_dtype=jnp.bfloat16):
    """Offline algebraic fusion of the double Q/K/V projections (exact, f32/highest),
    fold the attention scale into Q, concatenate K|V weights, cast weights to bf16."""
    (wq, bq, wk, bk, wv, bv, wiq, biq, wik, bik, wiv, biv,
     wo, bo, w1, b1, w2, b2, alpha_a, alpha_m) = params
    E = wq.shape[0]
    hd = E // num_heads
    scale = 1.0 / math.sqrt(hd)
    f32 = jnp.float32

    def mm(a, b):
        return jnp.dot(a.astype(f32), b.astype(f32), precision="highest")

    wq_f = mm(wq, wiq) * scale
    bq_f = (mm(bq, wiq) + biq) * scale
    wk_f = mm(wk, wik)
    bk_f = mm(bk, wik) + bik
    wv_f = mm(wv, wiv)
    bv_f = mm(bv, wiv) + biv
    w_kv = jnp.concatenate([wk_f, wv_f], axis=1)       # (E, 2E) — one wide K|V matmul
    b_kv = jnp.concatenate([bk_f, bv_f], axis=1)       # (1, 2E)

    cd = compute_dtype
    return [wq_f.astype(cd), bq_f.astype(f32),
            w_kv.astype(cd), b_kv.astype(f32),
            wo.astype(cd), bo.astype(f32),
            w1.astype(cd), b1.astype(f32),
            w2.astype(cd), b2.astype(f32),
            alpha_a.astype(f32), alpha_m.astype(f32)]


def normalized_transformer_block(x, params, num_heads, block_q=None):
    B, S, E = x.shape
    assert E % num_heads == 0
    fused = fuse_params(params, num_heads)

    if block_q is None:
        block_q = S
        for cand in (512, 256, 128, 64, 32, 16, 8):
            if S % cand == 0:
                block_q = cand
                break
    assert S % block_q == 0
    nq = S // block_q

    def const_spec(p):
        return pl.BlockSpec(p.shape, lambda b, q, _n=p.ndim: (0,) * _n)

    weight_specs = [const_spec(p) for p in fused]

    return pl.pallas_call(
        partial(_block_kernel, num_heads),
        out_shape=jax.ShapeDtypeStruct((B, S, E), x.dtype),
        grid_spec=pltpu.PrefetchScalarGridSpec(
            num_scalar_prefetch=0,
            grid=(B, nq),
            in_specs=[pl.BlockSpec((None, S, E), lambda b, q: (b, 0, 0))] + weight_specs,
            out_specs=pl.BlockSpec((None, block_q, E), lambda b, q: (b, q, 0)),
            scratch_shapes=[pltpu.VMEM((block_q, E), jnp.float32)],
        ),
        compiler_params=pltpu.CompilerParams(
            dimension_semantics=("parallel", "parallel"),
            vmem_limit_bytes=48 * 1024 * 1024,
        ),
    )(x, *fused)


def init_params(key, embed_dim, ff_dim, alpha_A=0.1, alpha_M=0.1):
    E, F = embed_dim, ff_dim

    def linear(k, fan_in, fan_out):
        kw, kb = jax.random.split(k)
        bound = 1.0 / math.sqrt(fan_in)
        w = jax.random.uniform(kw, (fan_in, fan_out), jnp.float32, -bound, bound)
        b = jax.random.uniform(kb, (1, fan_out), jnp.float32, -bound, bound)
        return w, b

    keys = jax.random.split(key, 9)
    wq, bq = linear(keys[0], E, E)
    wk, bk = linear(keys[1], E, E)
    wv, bv = linear(keys[2], E, E)
    wiq, biq = linear(keys[3], E, E)   # nn.MultiheadAttention in_proj q-chunk (transposed)
    wik, bik = linear(keys[4], E, E)   # in_proj k-chunk
    wiv, biv = linear(keys[5], E, E)   # in_proj v-chunk
    wo, bo = linear(keys[6], E, E)     # out_proj
    w1, b1 = linear(keys[7], E, F)     # mlp Linear(E, F)
    w2, b2 = linear(keys[8], F, E)     # mlp Linear(F, E)
    alpha_a = jnp.full((1, E), alpha_A, jnp.float32)
    alpha_m = jnp.full((1, E), alpha_M, jnp.float32)
    return [wq, bq, wk, bk, wv, bv, wiq, biq, wik, bik, wiv, biv,
            wo, bo, w1, b1, w2, b2, alpha_a, alpha_m]


def _reference(x, params, num_heads):
    # Pure-JAX f32 reference of the same math (unfused, highest precision).
    (wq, bq, wk, bk, wv, bv, wiq, biq, wik, bik, wiv, biv,
     wo, bo, w1, b1, w2, b2, alpha_a, alpha_m) = params
    B, S, E = x.shape
    hd = E // num_heads
    mu = jnp.mean(x, axis=-1, keepdims=True)
    var = jnp.mean((x - mu) ** 2, axis=-1, keepdims=True)
    xn = (x - mu) / jnp.sqrt(var + EPS_LN)
    dot = partial(jnp.einsum, precision="highest")
    q = dot("bse,ef->bsf", xn, wq) + bq
    k = dot("bse,ef->bsf", xn, wk) + bk
    v = dot("bse,ef->bsf", xn, wv) + bv
    q = (dot("bse,ef->bsf", q, wiq) + biq).reshape(B, S, num_heads, hd)
    k = (dot("bse,ef->bsf", k, wik) + bik).reshape(B, S, num_heads, hd)
    v = (dot("bse,ef->bsf", v, wiv) + biv).reshape(B, S, num_heads, hd)
    s = dot("bqhd,bkhd->bhqk", q, k) / math.sqrt(hd)
    mask = jnp.triu(jnp.ones((S, S), bool), k=1)
    s = jnp.where(mask, -jnp.inf, s)
    p = jax.nn.softmax(s, axis=-1)
    o = dot("bhqk,bkhd->bqhd", p, v).reshape(B, S, E)
    attn = dot("bse,ef->bsf", o, wo) + bo

    def l2n(t):
        return t / jnp.linalg.norm(t, axis=-1, keepdims=True)

    h_A = l2n(attn)
    h1 = l2n(x + alpha_a * (h_A - x))
    m = jnp.maximum(dot("bse,ef->bsf", h1, w1) + b1, 0.0)
    m = dot("bsf,fe->bse", m, w2) + b2
    h_M = l2n(m)
    return l2n(h1 + alpha_m * (h_M - h1))


if __name__ == "__main__":
    B, S, E, H, FF = 2, 16, 32, 4, 64
    key = jax.random.PRNGKey(0)
    kx, kp = jax.random.split(key)
    x = jax.random.normal(kx, (B, S, E), jnp.float32)
    params = init_params(kp, E, FF)

    # block_q=8 -> 2 query tiles per batch element, exercising the (batch, q-tile) grid.
    out = normalized_transformer_block(x, params, num_heads=H, block_q=8)
    out = jax.block_until_ready(out)

    ref = jax.block_until_ready(_reference(x, params, H))
    assert out.shape == (B, S, E)
    # bf16 MXU inputs vs f32 "highest" reference -> loosened tolerance.
    assert jnp.allclose(out, ref, atol=2e-2, rtol=2e-2), "mismatch vs pure-JAX reference"
    print("KERNEL_OK")
</pallas_src>

<mosaic_0001>
module attributes {stable_mosaic.version = 11 : i64} {
  func.func @_block_kernel(%arg0: i32, %arg1: i32, %arg2: memref<1x16x32xf32, #tpu.memory_space<vmem>>, %arg3: memref<32x32xbf16, #tpu.memory_space<vmem>>, %arg4: memref<1x32xf32, #tpu.memory_space<vmem>>, %arg5: memref<32x64xbf16, #tpu.memory_space<vmem>>, %arg6: memref<1x64xf32, #tpu.memory_space<vmem>>, %arg7: memref<32x32xbf16, #tpu.memory_space<vmem>>, %arg8: memref<1x32xf32, #tpu.memory_space<vmem>>, %arg9: memref<32x64xbf16, #tpu.memory_space<vmem>>, %arg10: memref<1x64xf32, #tpu.memory_space<vmem>>, %arg11: memref<64x32xbf16, #tpu.memory_space<vmem>>, %arg12: memref<1x32xf32, #tpu.memory_space<vmem>>, %arg13: memref<1x32xf32, #tpu.memory_space<vmem>>, %arg14: memref<1x32xf32, #tpu.memory_space<vmem>>, %arg15: memref<1x8x32xf32, #tpu.memory_space<vmem>>, %arg16: memref<8x32xf32, #tpu.memory_space<vmem>>) attributes {dimension_semantics = [#tpu.dimension_semantics<parallel>, #tpu.dimension_semantics<parallel>], iteration_bounds = array<i64: 2, 2>, scalar_prefetch = 0 : i64, scratch_operands = 1 : i64, tpu.core_type = #tpu.core_type<tc>, window_params = [{transform_indices = @transform_0, window_bounds = array<i64: 1, 16, 32>}, {pipeline_mode = #tpu.pipeline_mode<synchronous>, transform_indices = @transform_1, window_bounds = array<i64: 32, 32>}, {pipeline_mode = #tpu.pipeline_mode<synchronous>, transform_indices = @transform_2, window_bounds = array<i64: 1, 32>}, {pipeline_mode = #tpu.pipeline_mode<synchronous>, transform_indices = @transform_3, window_bounds = array<i64: 32, 64>}, {pipeline_mode = #tpu.pipeline_mode<synchronous>, transform_indices = @transform_4, window_bounds = array<i64: 1, 64>}, {pipeline_mode = #tpu.pipeline_mode<synchronous>, transform_indices = @transform_5, window_bounds = array<i64: 32, 32>}, {pipeline_mode = #tpu.pipeline_mode<synchronous>, transform_indices = @transform_6, window_bounds = array<i64: 1, 32>}, {pipeline_mode = #tpu.pipeline_mode<synchronous>, transform_indices = @transform_7, window_bounds = array<i64: 32, 64>}, {pipeline_mode = #tpu.pipeline_mode<synchronous>, transform_indices = @transform_8, window_bounds = array<i64: 1, 64>}, {pipeline_mode = #tpu.pipeline_mode<synchronous>, transform_indices = @transform_9, window_bounds = array<i64: 64, 32>}, {pipeline_mode = #tpu.pipeline_mode<synchronous>, transform_indices = @transform_10, window_bounds = array<i64: 1, 32>}, {pipeline_mode = #tpu.pipeline_mode<synchronous>, transform_indices = @transform_11, window_bounds = array<i64: 1, 32>}, {pipeline_mode = #tpu.pipeline_mode<synchronous>, transform_indices = @transform_12, window_bounds = array<i64: 1, 32>}, {transform_indices = @transform_13, window_bounds = array<i64: 1, 8, 32>}]} {
    %c8_i32 = arith.constant 8 : i32
    %0 = arith.muli %arg1, %c8_i32 : i32
    %1 = tpu.assume_multiple %0, 8 : i32
    %c0 = arith.constant 0 : index
    %2 = arith.index_cast %1 : i32 to index
    %c0_0 = arith.constant 0 : index
    %3 = vector.load %arg2[%c0, %2, %c0_0] : memref<1x16x32xf32, #tpu.memory_space<vmem>>, vector<1x8x32xf32>
    %4 = vector.shape_cast %3 : vector<1x8x32xf32> to vector<8x32xf32>
    %c0_1 = arith.constant 0 : index
    %c0_2 = arith.constant 0 : index
    %c0_3 = arith.constant 0 : index
    %5 = vector.load %arg2[%c0_1, %c0_2, %c0_3] : memref<1x16x32xf32, #tpu.memory_space<vmem>>, vector<1x16x32xf32>
    %6 = vector.shape_cast %5 : vector<1x16x32xf32> to vector<16x32xf32>
    %cst = arith.constant dense<0.000000e+00> : vector<8xf32>
    %7 = vector.multi_reduction <add>, %4, %cst [1] : vector<8x32xf32> to vector<8xf32>
    %8 = vector.shape_cast %7 : vector<8xf32> to vector<8x1xf32>
    %cst_4 = arith.constant 3.200000e+01 : f32
    %9 = vector.broadcast %cst_4 : f32 to vector<8x1xf32>
    %10 = arith.divf %8, %9 : vector<8x1xf32>
    %11 = vector.broadcast %10 : vector<8x1xf32> to vector<8x32xf32>
    %12 = arith.subf %4, %11 : vector<8x32xf32>
    %13 = arith.mulf %12, %12 : vector<8x32xf32>
    %cst_5 = arith.constant dense<0.000000e+00> : vector<8xf32>
    %14 = vector.multi_reduction <add>, %13, %cst_5 [1] : vector<8x32xf32> to vector<8xf32>
    %15 = vector.shape_cast %14 : vector<8xf32> to vector<8x1xf32>
    %cst_6 = arith.constant 3.200000e+01 : f32
    %16 = vector.broadcast %cst_6 : f32 to vector<8x1xf32>
    %17 = arith.divf %15, %16 : vector<8x1xf32>
    %18 = vector.broadcast %10 : vector<8x1xf32> to vector<8x32xf32>
    %19 = arith.subf %4, %18 : vector<8x32xf32>
    %cst_7 = arith.constant 9.99999974E-6 : f32
    %20 = vector.broadcast %cst_7 : f32 to vector<8x1xf32>
    %21 = arith.addf %17, %20 : vector<8x1xf32>
    %22 = math.rsqrt %21 : vector<8x1xf32>
    %23 = vector.broadcast %22 : vector<8x1xf32> to vector<8x32xf32>
    %24 = arith.mulf %19, %23 : vector<8x32xf32>
    %25 = arith.truncf %24 : vector<8x32xf32> to vector<8x32xbf16>
    %cst_8 = arith.constant dense<0.000000e+00> : vector<16xf32>
    %26 = vector.multi_reduction <add>, %6, %cst_8 [1] : vector<16x32xf32> to vector<16xf32>
    %27 = vector.shape_cast %26 : vector<16xf32> to vector<16x1xf32>
    %cst_9 = arith.constant 3.200000e+01 : f32
    %28 = vector.broadcast %cst_9 : f32 to vector<16x1xf32>
    %29 = arith.divf %27, %28 : vector<16x1xf32>
    %30 = vector.broadcast %29 : vector<16x1xf32> to vector<16x32xf32>
    %31 = arith.subf %6, %30 : vector<16x32xf32>
    %32 = arith.mulf %31, %31 : vector<16x32xf32>
    %cst_10 = arith.constant dense<0.000000e+00> : vector<16xf32>
    %33 = vector.multi_reduction <add>, %32, %cst_10 [1] : vector<16x32xf32> to vector<16xf32>
    %34 = vector.shape_cast %33 : vector<16xf32> to vector<16x1xf32>
    %cst_11 = arith.constant 3.200000e+01 : f32
    %35 = vector.broadcast %cst_11 : f32 to vector<16x1xf32>
    %36 = arith.divf %34, %35 : vector<16x1xf32>
    %37 = vector.broadcast %29 : vector<16x1xf32> to vector<16x32xf32>
    %38 = arith.subf %6, %37 : vector<16x32xf32>
    %cst_12 = arith.constant 9.99999974E-6 : f32
    %39 = vector.broadcast %cst_12 : f32 to vector<16x1xf32>
    %40 = arith.addf %36, %39 : vector<16x1xf32>
    %41 = math.rsqrt %40 : vector<16x1xf32>
    %42 = vector.broadcast %41 : vector<16x1xf32> to vector<16x32xf32>
    %43 = arith.mulf %38, %42 : vector<16x32xf32>
    %44 = arith.truncf %43 : vector<16x32xf32> to vector<16x32xbf16>
    %c0_13 = arith.constant 0 : index
    %c0_14 = arith.constant 0 : index
    %45 = vector.load %arg3[%c0_13, %c0_14] : memref<32x32xbf16, #tpu.memory_space<vmem>>, vector<32x32xbf16>
    %cst_15 = arith.constant dense<0.000000e+00> : vector<8x32xf32>
    %46 = tpu.matmul %25, %45, %cst_15 {dimension_numbers = #tpu.dot_dimension_numbers<[1], [0], [0], [1], [0, 0, 1, 1], [], []>} : vector<8x32xbf16>, vector<32x32xbf16>, vector<8x32xf32> -> vector<8x32xf32>
    %c0_16 = arith.constant 0 : index
    %c0_17 = arith.constant 0 : index
    %47 = vector.load %arg4[%c0_16, %c0_17] : memref<1x32xf32, #tpu.memory_space<vmem>>, vector<1x32xf32>
    %48 = vector.broadcast %47 : vector<1x32xf32> to vector<8x32xf32>
    %49 = arith.addf %46, %48 : vector<8x32xf32>
    %c0_18 = arith.constant 0 : index
    %c0_19 = arith.constant 0 : index
    %50 = vector.load %arg5[%c0_18, %c0_19] : memref<32x64xbf16, #tpu.memory_space<vmem>>, vector<32x64xbf16>
    %cst_20 = arith.constant dense<0.000000e+00> : vector<16x64xf32>
    %51 = tpu.matmul %44, %50, %cst_20 {dimension_numbers = #tpu.dot_dimension_numbers<[1], [0], [0], [1], [0, 0, 1, 1], [], []>} : vector<16x32xbf16>, vector<32x64xbf16>, vector<16x64xf32> -> vector<16x64xf32>
    %c0_21 = arith.constant 0 : index
    %c0_22 = arith.constant 0 : index
    %52 = vector.load %arg6[%c0_21, %c0_22] : memref<1x64xf32, #tpu.memory_space<vmem>>, vector<1x64xf32>
    %53 = vector.broadcast %52 : vector<1x64xf32> to vector<16x64xf32>
    %54 = arith.addf %51, %53 : vector<16x64xf32>
    %55 = vector.extract_strided_slice %54 {offsets = [0, 0], sizes = [16, 32], strides = [1, 1]} : vector<16x64xf32> to vector<16x32xf32>
    %56 = vector.extract_strided_slice %54 {offsets = [0, 32], sizes = [16, 32], strides = [1, 1]} : vector<16x64xf32> to vector<16x32xf32>
    %57 = tpu.iota {dimensions = array<i32: 0>} : vector<8x16xi32>
    %58 = vector.broadcast %1 : i32 to vector<8x16xi32>
    %59 = arith.addi %58, %57 : vector<8x16xi32>
    %60 = tpu.iota {dimensions = array<i32: 1>} : vector<8x16xi32>
    %61 = arith.cmpi sgt, %60, %59 : vector<8x16xi32>
    %62 = vector.extract_strided_slice %49 {offsets = [0, 0], sizes = [8, 8], strides = [1, 1]} : vector<8x32xf32> to vector<8x8xf32>
    %63 = arith.truncf %62 : vector<8x8xf32> to vector<8x8xbf16>
    %64 = vector.extract_strided_slice %55 {offsets = [0, 0], sizes = [16, 8], strides = [1, 1]} : vector<16x32xf32> to vector<16x8xf32>
    %65 = arith.truncf %64 : vector<16x8xf32> to vector<16x8xbf16>
    %66 = vector.extract_strided_slice %56 {offsets = [0, 0], sizes = [16, 8], strides = [1, 1]} : vector<16x32xf32> to vector<16x8xf32>
    %67 = arith.truncf %66 : vector<16x8xf32> to vector<16x8xbf16>
    %68 = tpu.transpose %65, [1, 0] : vector<16x8xbf16> -> vector<8x16xbf16>
    %cst_23 = arith.constant dense<0.000000e+00> : vector<8x16xf32>
    %69 = tpu.matmul %63, %68, %cst_23 {dimension_numbers = #tpu.dot_dimension_numbers<[1], [0], [0], [1], [0, 0, 1, 1], [], []>} : vector<8x8xbf16>, vector<8x16xbf16>, vector<8x16xf32> -> vector<8x16xf32>
    %cst_24 = arith.constant 0xFF800000 : f32
    %70 = vector.broadcast %cst_24 : f32 to vector<8x16xf32>
    %71 = arith.select %61, %70, %69 : vector<8x16xi1>, vector<8x16xf32>
    %cst_25 = arith.constant dense<0xFF800000> : vector<8xf32>
    %72 = vector.multi_reduction <maximumf>, %71, %cst_25 [1] : vector<8x16xf32> to vector<8xf32>
    %73 = vector.shape_cast %72 : vector<8xf32> to vector<8x1xf32>
    %74 = vector.broadcast %73 : vector<8x1xf32> to vector<8x16xf32>
    %75 = arith.subf %71, %74 : vector<8x16xf32>
    %76 = math.exp %75 : vector<8x16xf32>
    %cst_26 = arith.constant dense<0.000000e+00> : vector<8xf32>
    %77 = vector.multi_reduction <add>, %76, %cst_26 [1] : vector<8x16xf32> to vector<8xf32>
    %78 = vector.shape_cast %77 : vector<8xf32> to vector<8x1xf32>
    %79 = arith.truncf %76 : vector<8x16xf32> to vector<8x16xbf16>
    %cst_27 = arith.constant dense<0.000000e+00> : vector<8x8xf32>
    %80 = tpu.matmul %79, %67, %cst_27 {dimension_numbers = #tpu.dot_dimension_numbers<[1], [0], [0], [1], [0, 0, 1, 1], [], []>} : vector<8x16xbf16>, vector<16x8xbf16>, vector<8x8xf32> -> vector<8x8xf32>
    %81 = tpu.reciprocal %78 {approx = true} : vector<8x1xf32> -> vector<8x1xf32>
    %82 = vector.broadcast %81 : vector<8x1xf32> to vector<8x8xf32>
    %83 = arith.mulf %80, %82 : vector<8x8xf32>
    %c0_28 = arith.constant 0 : index
    %c0_29 = arith.constant 0 : index
    %84 = vector.load %arg16[%c0_28, %c0_29] : memref<8x32xf32, #tpu.memory_space<vmem>>, vector<8x8xf32>
    tpu.vector_store %arg16[%c0_28, %c0_29], %83 {strides = array<i32>} : memref<8x32xf32, #tpu.memory_space<vmem>>, vector<8x8xf32>,
    %85 = vector.extract_strided_slice %49 {offsets = [0, 8], sizes = [8, 8], strides = [1, 1]} : vector<8x32xf32> to vector<8x8xf32>
    %86 = arith.truncf %85 : vector<8x8xf32> to vector<8x8xbf16>
    %87 = vector.extract_strided_slice %55 {offsets = [0, 8], sizes = [16, 8], strides = [1, 1]} : vector<16x32xf32> to vector<16x8xf32>
    %88 = arith.truncf %87 : vector<16x8xf32> to vector<16x8xbf16>
    %89 = vector.extract_strided_slice %56 {offsets = [0, 8], sizes = [16, 8], strides = [1, 1]} : vector<16x32xf32> to vector<16x8xf32>
    %90 = arith.truncf %89 : vector<16x8xf32> to vector<16x8xbf16>
    %91 = tpu.transpose %88, [1, 0] : vector<16x8xbf16> -> vector<8x16xbf16>
    %cst_30 = arith.constant dense<0.000000e+00> : vector<8x16xf32>
    %92 = tpu.matmul %86, %91, %cst_30 {dimension_numbers = #tpu.dot_dimension_numbers<[1], [0], [0], [1], [0, 0, 1, 1], [], []>} : vector<8x8xbf16>, vector<8x16xbf16>, vector<8x16xf32> -> vector<8x16xf32>
    %cst_31 = arith.constant 0xFF800000 : f32
    %93 = vector.broadcast %cst_31 : f32 to vector<8x16xf32>
    %94 = arith.select %61, %93, %92 : vector<8x16xi1>, vector<8x16xf32>
    %cst_32 = arith.constant dense<0xFF800000> : vector<8xf32>
    %95 = vector.multi_reduction <maximumf>, %94, %cst_32 [1] : vector<8x16xf32> to vector<8xf32>
    %96 = vector.shape_cast %95 : vector<8xf32> to vector<8x1xf32>
    %97 = vector.broadcast %96 : vector<8x1xf32> to vector<8x16xf32>
    %98 = arith.subf %94, %97 : vector<8x16xf32>
    %99 = math.exp %98 : vector<8x16xf32>
    %cst_33 = arith.constant dense<0.000000e+00> : vector<8xf32>
    %100 = vector.multi_reduction <add>, %99, %cst_33 [1] : vector<8x16xf32> to vector<8xf32>
    %101 = vector.shape_cast %100 : vector<8xf32> to vector<8x1xf32>
    %102 = arith.truncf %99 : vector<8x16xf32> to vector<8x16xbf16>
    %cst_34 = arith.constant dense<0.000000e+00> : vector<8x8xf32>
    %103 = tpu.matmul %102, %90, %cst_34 {dimension_numbers = #tpu.dot_dimension_numbers<[1], [0], [0], [1], [0, 0, 1, 1], [], []>} : vector<8x16xbf16>, vector<16x8xbf16>, vector<8x8xf32> -> vector<8x8xf32>
    %104 = tpu.reciprocal %101 {approx = true} : vector<8x1xf32> -> vector<8x1xf32>
    %105 = vector.broadcast %104 : vector<8x1xf32> to vector<8x8xf32>
    %106 = arith.mulf %103, %105 : vector<8x8xf32>
    %c0_35 = arith.constant 0 : index
    %c8 = arith.constant 8 : index
    %107 = vector.load %arg16[%c0_35, %c8] : memref<8x32xf32, #tpu.memory_space<vmem>>, vector<8x8xf32>
    tpu.vector_store %arg16[%c0_35, %c8], %106 {strides = array<i32>} : memref<8x32xf32, #tpu.memory_space<vmem>>, vector<8x8xf32>,
    %108 = vector.extract_strided_slice %49 {offsets = [0, 16], sizes = [8, 8], strides = [1, 1]} : vector<8x32xf32> to vector<8x8xf32>
    %109 = arith.truncf %108 : vector<8x8xf32> to vector<8x8xbf16>
    %110 = vector.extract_strided_slice %55 {offsets = [0, 16], sizes = [16, 8], strides = [1, 1]} : vector<16x32xf32> to vector<16x8xf32>
    %111 = arith.truncf %110 : vector<16x8xf32> to vector<16x8xbf16>
    %112 = vector.extract_strided_slice %56 {offsets = [0, 16], sizes = [16, 8], strides = [1, 1]} : vector<16x32xf32> to vector<16x8xf32>
    %113 = arith.truncf %112 : vector<16x8xf32> to vector<16x8xbf16>
    %114 = tpu.transpose %111, [1, 0] : vector<16x8xbf16> -> vector<8x16xbf16>
    %cst_36 = arith.constant dense<0.000000e+00> : vector<8x16xf32>
    %115 = tpu.matmul %109, %114, %cst_36 {dimension_numbers = #tpu.dot_dimension_numbers<[1], [0], [0], [1], [0, 0, 1, 1], [], []>} : vector<8x8xbf16>, vector<8x16xbf16>, vector<8x16xf32> -> vector<8x16xf32>
    %cst_37 = arith.constant 0xFF800000 : f32
    %116 = vector.broadcast %cst_37 : f32 to vector<8x16xf32>
    %117 = arith.select %61, %116, %115 : vector<8x16xi1>, vector<8x16xf32>
    %cst_38 = arith.constant dense<0xFF800000> : vector<8xf32>
    %118 = vector.multi_reduction <maximumf>, %117, %cst_38 [1] : vector<8x16xf32> to vector<8xf32>
    %119 = vector.shape_cast %118 : vector<8xf32> to vector<8x1xf32>
    %120 = vector.broadcast %119 : vector<8x1xf32> to vector<8x16xf32>
    %121 = arith.subf %117, %120 : vector<8x16xf32>
    %122 = math.exp %121 : vector<8x16xf32>
    %cst_39 = arith.constant dense<0.000000e+00> : vector<8xf32>
    %123 = vector.multi_reduction <add>, %122, %cst_39 [1] : vector<8x16xf32> to vector<8xf32>
    %124 = vector.shape_cast %123 : vector<8xf32> to vector<8x1xf32>
    %125 = arith.truncf %122 : vector<8x16xf32> to vector<8x16xbf16>
    %cst_40 = arith.constant dense<0.000000e+00> : vector<8x8xf32>
    %126 = tpu.matmul %125, %113, %cst_40 {dimension_numbers = #tpu.dot_dimension_numbers<[1], [0], [0], [1], [0, 0, 1, 1], [], []>} : vector<8x16xbf16>, vector<16x8xbf16>, vector<8x8xf32> -> vector<8x8xf32>
    %127 = tpu.reciprocal %124 {approx = true} : vector<8x1xf32> -> vector<8x1xf32>
    %128 = vector.broadcast %127 : vector<8x1xf32> to vector<8x8xf32>
    %129 = arith.mulf %126, %128 : vector<8x8xf32>
    %c0_41 = arith.constant 0 : index
    %c16 = arith.constant 16 : index
    %130 = vector.load %arg16[%c0_41, %c16] : memref<8x32xf32, #tpu.memory_space<vmem>>, vector<8x8xf32>
    tpu.vector_store %arg16[%c0_41, %c16], %129 {strides = array<i32>} : memref<8x32xf32, #tpu.memory_space<vmem>>, vector<8x8xf32>,
    %131 = vector.extract_strided_slice %49 {offsets = [0, 24], sizes = [8, 8], strides = [1, 1]} : vector<8x32xf32> to vector<8x8xf32>
    %132 = arith.truncf %131 : vector<8x8xf32> to vector<8x8xbf16>
    %133 = vector.extract_strided_slice %55 {offsets = [0, 24], sizes = [16, 8], strides = [1, 1]} : vector<16x32xf32> to vector<16x8xf32>
    %134 = arith.truncf %133 : vector<16x8xf32> to vector<16x8xbf16>
    %135 = vector.extract_strided_slice %56 {offsets = [0, 24], sizes = [16, 8], strides = [1, 1]} : vector<16x32xf32> to vector<16x8xf32>
    %136 = arith.truncf %135 : vector<16x8xf32> to vector<16x8xbf16>
    %137 = tpu.transpose %134, [1, 0] : vector<16x8xbf16> -> vector<8x16xbf16>
    %cst_42 = arith.constant dense<0.000000e+00> : vector<8x16xf32>
    %138 = tpu.matmul %132, %137, %cst_42 {dimension_numbers = #tpu.dot_dimension_numbers<[1], [0], [0], [1], [0, 0, 1, 1], [], []>} : vector<8x8xbf16>, vector<8x16xbf16>, vector<8x16xf32> -> vector<8x16xf32>
    %cst_43 = arith.constant 0xFF800000 : f32
    %139 = vector.broadcast %cst_43 : f32 to vector<8x16xf32>
    %140 = arith.select %61, %139, %138 : vector<8x16xi1>, vector<8x16xf32>
    %cst_44 = arith.constant dense<0xFF800000> : vector<8xf32>
    %141 = vector.multi_reduction <maximumf>, %140, %cst_44 [1] : vector<8x16xf32> to vector<8xf32>
    %142 = vector.shape_cast %141 : vector<8xf32> to vector<8x1xf32>
    %143 = vector.broadcast %142 : vector<8x1xf32> to vector<8x16xf32>
    %144 = arith.subf %140, %143 : vector<8x16xf32>
    %145 = math.exp %144 : vector<8x16xf32>
    %cst_45 = arith.constant dense<0.000000e+00> : vector<8xf32>
    %146 = vector.multi_reduction <add>, %145, %cst_45 [1] : vector<8x16xf32> to vector<8xf32>
    %147 = vector.shape_cast %146 : vector<8xf32> to vector<8x1xf32>
    %148 = arith.truncf %145 : vector<8x16xf32> to vector<8x16xbf16>
    %cst_46 = arith.constant dense<0.000000e+00> : vector<8x8xf32>
    %149 = tpu.matmul %148, %136, %cst_46 {dimension_numbers = #tpu.dot_dimension_numbers<[1], [0], [0], [1], [0, 0, 1, 1], [], []>} : vector<8x16xbf16>, vector<16x8xbf16>, vector<8x8xf32> -> vector<8x8xf32>
    %150 = tpu.reciprocal %147 {approx = true} : vector<8x1xf32> -> vector<8x1xf32>
    %151 = vector.broadcast %150 : vector<8x1xf32> to vector<8x8xf32>
    %152 = arith.mulf %149, %151 : vector<8x8xf32>
    %c0_47 = arith.constant 0 : index
    %c24 = arith.constant 24 : index
    %153 = vector.load %arg16[%c0_47, %c24] : memref<8x32xf32, #tpu.memory_space<vmem>>, vector<8x8xf32>
    tpu.vector_store %arg16[%c0_47, %c24], %152 {strides = array<i32>} : memref<8x32xf32, #tpu.memory_space<vmem>>, vector<8x8xf32>,
    %c0_48 = arith.constant 0 : index
    %c0_49 = arith.constant 0 : index
    %154 = vector.load %arg16[%c0_48, %c0_49] : memref<8x32xf32, #tpu.memory_space<vmem>>, vector<8x32xf32>
    %155 = arith.truncf %154 : vector<8x32xf32> to vector<8x32xbf16>
    %c0_50 = arith.constant 0 : index
    %c0_51 = arith.constant 0 : index
    %156 = vector.load %arg7[%c0_50, %c0_51] : memref<32x32xbf16, #tpu.memory_space<vmem>>, vector<32x32xbf16>
    %cst_52 = arith.constant dense<0.000000e+00> : vector<8x32xf32>
    %157 = tpu.matmul %155, %156, %cst_52 {dimension_numbers = #tpu.dot_dimension_numbers<[1], [0], [0], [1], [0, 0, 1, 1], [], []>} : vector<8x32xbf16>, vector<32x32xbf16>, vector<8x32xf32> -> vector<8x32xf32>
    %c0_53 = arith.constant 0 : index
    %c0_54 = arith.constant 0 : index
    %158 = vector.load %arg8[%c0_53, %c0_54] : memref<1x32xf32, #tpu.memory_space<vmem>>, vector<1x32xf32>
    %159 = vector.broadcast %158 : vector<1x32xf32> to vector<8x32xf32>
    %160 = arith.addf %157, %159 : vector<8x32xf32>
    %c0_55 = arith.constant 0 : index
    %c0_56 = arith.constant 0 : index
    %161 = vector.load %arg13[%c0_55, %c0_56] : memref<1x32xf32, #tpu.memory_space<vmem>>, vector<1x32xf32>
    %c0_57 = arith.constant 0 : index
    %c0_58 = arith.constant 0 : index
    %162 = vector.load %arg14[%c0_57, %c0_58] : memref<1x32xf32, #tpu.memory_space<vmem>>, vector<1x32xf32>
    %163 = arith.mulf %160, %160 : vector<8x32xf32>
    %cst_59 = arith.constant dense<0.000000e+00> : vector<8xf32>
    %164 = vector.multi_reduction <add>, %163, %cst_59 [1] : vector<8x32xf32> to vector<8xf32>
    %165 = vector.shape_cast %164 : vector<8xf32> to vector<8x1xf32>
    %cst_60 = arith.constant 9.99999996E-13 : f32
    %166 = vector.broadcast %cst_60 : f32 to vector<8x1xf32>
    %167 = arith.addf %165, %166 : vector<8x1xf32>
    %168 = math.rsqrt %167 : vector<8x1xf32>
    %169 = vector.broadcast %168 : vector<8x1xf32> to vector<8x32xf32>
    %170 = arith.mulf %160, %169 : vector<8x32xf32>
    %171 = arith.subf %170, %4 : vector<8x32xf32>
    %172 = vector.broadcast %161 : vector<1x32xf32> to vector<8x32xf32>
    %173 = arith.mulf %172, %171 : vector<8x32xf32>
    %174 = arith.addf %4, %173 : vector<8x32xf32>
    %175 = arith.mulf %174, %174 : vector<8x32xf32>
    %cst_61 = arith.constant dense<0.000000e+00> : vector<8xf32>
    %176 = vector.multi_reduction <add>, %175, %cst_61 [1] : vector<8x32xf32> to vector<8xf32>
    %177 = vector.shape_cast %176 : vector<8xf32> to vector<8x1xf32>
    %cst_62 = arith.constant 9.99999996E-13 : f32
    %178 = vector.broadcast %cst_62 : f32 to vector<8x1xf32>
    %179 = arith.addf %177, %178 : vector<8x1xf32>
    %180 = math.rsqrt %179 : vector<8x1xf32>
    %181 = vector.broadcast %180 : vector<8x1xf32> to vector<8x32xf32>
    %182 = arith.mulf %174, %181 : vector<8x32xf32>
    %183 = arith.truncf %182 : vector<8x32xf32> to vector<8x32xbf16>
    %c0_63 = arith.constant 0 : index
    %c0_64 = arith.constant 0 : index
    %184 = vector.load %arg9[%c0_63, %c0_64] : memref<32x64xbf16, #tpu.memory_space<vmem>>, vector<32x64xbf16>
    %cst_65 = arith.constant dense<0.000000e+00> : vector<8x64xf32>
    %185 = tpu.matmul %183, %184, %cst_65 {dimension_numbers = #tpu.dot_dimension_numbers<[1], [0], [0], [1], [0, 0, 1, 1], [], []>} : vector<8x32xbf16>, vector<32x64xbf16>, vector<8x64xf32> -> vector<8x64xf32>
    %c0_66 = arith.constant 0 : index
    %c0_67 = arith.constant 0 : index
    %186 = vector.load %arg10[%c0_66, %c0_67] : memref<1x64xf32, #tpu.memory_space<vmem>>, vector<1x64xf32>
    %187 = vector.broadcast %186 : vector<1x64xf32> to vector<8x64xf32>
    %188 = arith.addf %185, %187 : vector<8x64xf32>
    %cst_68 = arith.constant 0.000000e+00 : f32
    %189 = vector.broadcast %cst_68 : f32 to vector<8x64xf32>
    %190 = arith.maximumf %188, %189 : vector<8x64xf32>
    %191 = arith.truncf %190 : vector<8x64xf32> to vector<8x64xbf16>
    %c0_69 = arith.constant 0 : index
    %c0_70 = arith.constant 0 : index
    %192 = vector.load %arg11[%c0_69, %c0_70] : memref<64x32xbf16, #tpu.memory_space<vmem>>, vector<64x32xbf16>
    %cst_71 = arith.constant dense<0.000000e+00> : vector<8x32xf32>
    %193 = tpu.matmul %191, %192, %cst_71 {dimension_numbers = #tpu.dot_dimension_numbers<[1], [0], [0], [1], [0, 0, 1, 1], [], []>} : vector<8x64xbf16>, vector<64x32xbf16>, vector<8x32xf32> -> vector<8x32xf32>
    %c0_72 = arith.constant 0 : index
    %c0_73 = arith.constant 0 : index
    %194 = vector.load %arg12[%c0_72, %c0_73] : memref<1x32xf32, #tpu.memory_space<vmem>>, vector<1x32xf32>
    %195 = vector.broadcast %194 : vector<1x32xf32> to vector<8x32xf32>
    %196 = arith.addf %193, %195 : vector<8x32xf32>
    %197 = arith.mulf %196, %196 : vector<8x32xf32>
    %cst_74 = arith.constant dense<0.000000e+00> : vector<8xf32>
    %198 = vector.multi_reduction <add>, %197, %cst_74 [1] : vector<8x32xf32> to vector<8xf32>
    %199 = vector.shape_cast %198 : vector<8xf32> to vector<8x1xf32>
    %cst_75 = arith.constant 9.99999996E-13 : f32
    %200 = vector.broadcast %cst_75 : f32 to vector<8x1xf32>
    %201 = arith.addf %199, %200 : vector<8x1xf32>
    %202 = math.rsqrt %201 : vector<8x1xf32>
    %203 = vector.broadcast %202 : vector<8x1xf32> to vector<8x32xf32>
    %204 = arith.mulf %196, %203 : vector<8x32xf32>
    %205 = arith.subf %204, %182 : vector<8x32xf32>
    %206 = vector.broadcast %162 : vector<1x32xf32> to vector<8x32xf32>
    %207 = arith.mulf %206, %205 : vector<8x32xf32>
    %208 = arith.addf %182, %207 : vector<8x32xf32>
    %209 = arith.mulf %208, %208 : vector<8x32xf32>
    %cst_76 = arith.constant dense<0.000000e+00> : vector<8xf32>
    %210 = vector.multi_reduction <add>, %209, %cst_76 [1] : vector<8x32xf32> to vector<8xf32>
    %211 = vector.shape_cast %210 : vector<8xf32> to vector<8x1xf32>
    %cst_77 = arith.constant 9.99999996E-13 : f32
    %212 = vector.broadcast %cst_77 : f32 to vector<8x1xf32>
    %213 = arith.addf %211, %212 : vector<8x1xf32>
    %214 = math.rsqrt %213 : vector<8x1xf32>
    %215 = vector.broadcast %214 : vector<8x1xf32> to vector<8x32xf32>
    %216 = arith.mulf %208, %215 : vector<8x32xf32>
    %c0_78 = arith.constant 0 : index
    %c0_79 = arith.constant 0 : index
    %c0_80 = arith.constant 0 : index
    %217 = vector.load %arg15[%c0_78, %c0_79, %c0_80] : memref<1x8x32xf32, #tpu.memory_space<vmem>>, vector<1x8x32xf32>
    %218 = vector.shape_cast %217 : vector<1x8x32xf32> to vector<8x32xf32>
    %219 = vector.shape_cast %216 : vector<8x32xf32> to vector<1x8x32xf32>
    tpu.vector_store %arg15[%c0_78, %c0_79, %c0_80], %219 {strides = array<i32>} : memref<1x8x32xf32, #tpu.memory_space<vmem>>, vector<1x8x32xf32>,
    return
  }
  func.func @transform_0(%arg0: i32, %arg1: i32) -> (i32, i32, i32) {
    %c0_i32 = arith.constant 0 : i32
    %c0_i32_0 = arith.constant 0 : i32
    %c0_i32_1 = arith.constant 0 : i32
    return %arg0, %c0_i32, %c0_i32_0 : i32, i32, i32
  }
  func.func @transform_1(%arg0: i32, %arg1: i32) -> (i32, i32) {
    %c0_i32 = arith.constant 0 : i32
    %c0_i32_0 = arith.constant 0 : i32
    %c0_i32_1 = arith.constant 0 : i32
    return %c0_i32, %c0_i32_0 : i32, i32
  }
  func.func @transform_2(%arg0: i32, %arg1: i32) -> (i32, i32) {
    %c0_i32 = arith.constant 0 : i32
    %c0_i32_0 = arith.constant 0 : i32
    %c0_i32_1 = arith.constant 0 : i32
    return %c0_i32, %c0_i32_0 : i32, i32
  }
  func.func @transform_3(%arg0: i32, %arg1: i32) -> (i32, i32) {
    %c0_i32 = arith.constant 0 : i32
    %c0_i32_0 = arith.constant 0 : i32
    %c0_i32_1 = arith.constant 0 : i32
    return %c0_i32, %c0_i32_0 : i32, i32
  }
  func.func @transform_4(%arg0: i32, %arg1: i32) -> (i32, i32) {
    %c0_i32 = arith.constant 0 : i32
    %c0_i32_0 = arith.constant 0 : i32
    %c0_i32_1 = arith.constant 0 : i32
    return %c0_i32, %c0_i32_0 : i32, i32
  }
  func.func @transform_5(%arg0: i32, %arg1: i32) -> (i32, i32) {
    %c0_i32 = arith.constant 0 : i32
    %c0_i32_0 = arith.constant 0 : i32
    %c0_i32_1 = arith.constant 0 : i32
    return %c0_i32, %c0_i32_0 : i32, i32
  }
  func.func @transform_6(%arg0: i32, %arg1: i32) -> (i32, i32) {
    %c0_i32 = arith.constant 0 : i32
    %c0_i32_0 = arith.constant 0 : i32
    %c0_i32_1 = arith.constant 0 : i32
    return %c0_i32, %c0_i32_0 : i32, i32
  }
  func.func @transform_7(%arg0: i32, %arg1: i32) -> (i32, i32) {
    %c0_i32 = arith.constant 0 : i32
    %c0_i32_0 = arith.constant 0 : i32
    %c0_i32_1 = arith.constant 0 : i32
    return %c0_i32, %c0_i32_0 : i32, i32
  }
  func.func @transform_8(%arg0: i32, %arg1: i32) -> (i32, i32) {
    %c0_i32 = arith.constant 0 : i32
    %c0_i32_0 = arith.constant 0 : i32
    %c0_i32_1 = arith.constant 0 : i32
    return %c0_i32, %c0_i32_0 : i32, i32
  }
  func.func @transform_9(%arg0: i32, %arg1: i32) -> (i32, i32) {
    %c0_i32 = arith.constant 0 : i32
    %c0_i32_0 = arith.constant 0 : i32
    %c0_i32_1 = arith.constant 0 : i32
    return %c0_i32, %c0_i32_0 : i32, i32
  }
  func.func @transform_10(%arg0: i32, %arg1: i32) -> (i32, i32) {
    %c0_i32 = arith.constant 0 : i32
    %c0_i32_0 = arith.constant 0 : i32
    %c0_i32_1 = arith.constant 0 : i32
    return %c0_i32, %c0_i32_0 : i32, i32
  }
  func.func @transform_11(%arg0: i32, %arg1: i32) -> (i32, i32) {
    %c0_i32 = arith.constant 0 : i32
    %c0_i32_0 = arith.constant 0 : i32
    %c0_i32_1 = arith.constant 0 : i32
    return %c0_i32, %c0_i32_0 : i32, i32
  }
  func.func @transform_12(%arg0: i32, %arg1: i32) -> (i32, i32) {
    %c0_i32 = arith.constant 0 : i32
    %c0_i32_0 = arith.constant 0 : i32
    %c0_i32_1 = arith.constant 0 : i32
    return %c0_i32, %c0_i32_0 : i32, i32
  }
  func.func @transform_13(%arg0: i32, %arg1: i32) -> (i32, i32, i32) {
    %c0_i32 = arith.constant 0 : i32
    %c0_i32_0 = arith.constant 0 : i32
    return %arg0, %arg1, %c0_i32 : i32, i32, i32
  }
}

</mosaic_0001>

<bundles_post_ra>
// kernel: tpu_custom_call.1
= control target key start
LH: loop header
LB: loop body
LE: loop exit
PB: predicated region body
PF: predicated region fallthrough
CT: control target
= control target key end

     0   :  { %s2528_s0 = inlined_call_operand.vmem [shape: f32[2,16,32], index: 0, kind: input, shape index: {}]   ;;  %s2529_s1 = inlined_call_operand.vmem [shape: bf16[32,32], index: 1, kind: input, shape index: {}]   ;;  %s2530_s2 = inlined_call_operand.vmem [shape: f32[1,32], index: 2, kind: input, shape index: {}]   ;;  %s2531_s3 = inlined_call_operand.hbm [shape: bf16[32,64], index: 3, kind: input, shape index: {}]   ;;  %s2532_s4 = inlined_call_operand.vmem [shape: f32[1,64], index: 4, kind: input, shape index: {}]   ;;  %s2533_s5 = inlined_call_operand.hbm [shape: bf16[32,32], index: 5, kind: input, shape index: {}]   ;;  %s2534_s6 = inlined_call_operand.vmem [shape: f32[1,32], index: 6, kind: input, shape index: {}]   ;;  %s2535_s7 = inlined_call_operand.hbm [shape: bf16[32,64], index: 7, kind: input, shape index: {}]   ;;  %s2536_s8 = inlined_call_operand.vmem [shape: f32[1,64], index: 8, kind: input, shape index: {}]   ;;  %s2537_s9 = inlined_call_operand.vmem [shape: bf16[64,32], index: 9, kind: input, shape index: {}]   ;;  %s2538_s10 = inlined_call_operand.vmem [shape: f32[1,32], index: 10, kind: input, shape index: {}]   ;;  %s2539_s11 = inlined_call_operand.vmem [shape: f32[1,32], index: 11, kind: input, shape index: {}]   ;;  %s2540_s12 = inlined_call_operand.vmem [shape: f32[1,32], index: 12, kind: input, shape index: {}]   ;;  %s2541_s13 = inlined_call_operand.hbm [shape: f32[2,16,32], index: 13, kind: output, shape index: {}]  }
   0x1   :  { %2559 = sst [smem:[#allocation24_spill]] %s2538_s10 }
   0x2   :  { %2560 = sst [smem:[#allocation25_spill]] %s2540_s12 }
   0x3   :  { %2561 = sst [smem:[#allocation26_spill]] %s2541_s13 }
   0x4   :  { %18 = vsyncpa [#allocation4], 0 }
   0x5   :  { %19 = vsyncpa [#allocation7], 0 }
   0x6   :  { %20 = vsyncpa [#allocation5], 0 }
   0x7   :  { %22 = vsyncpa [#allocation5 + $0x1], 0  ;;  %s2145_s25 = smov 0   ;;  %s2147_s26 = smov 0  }
   0x8   :  { %s2149_s27 = smov 0   ;;  %s2151_s28 = smov 0  }
   0x9   :  { %s2153_s29 = smov 0   ;;  %s2155_s30 = smov 0  }
   0xa   :  { %s2157_s14 = smov 0   ;;  %s2159_s15 = smov 0  }
   0xb LB: > { %2562 = sst [smem:[#allocation13_spill]] %s2027_s25  ;;  %s1533_s16 = sadd.s32 4294967295, %s2055_s15   ;;  %s2055_s15 = sphi %s2159_s15, %s28_s15   ;;  %s2051_s14 = sphi %s2157_s14, %s2597_s14   ;;  %s2047_s30 = sphi %s2155_s30, %s2596_s30   ;;  %s2043_s29 = sphi %s2153_s29, %s2595_s29   ;;  %s2039_s28 = sphi %s2151_s28, %s2594_s28   ;;  %s2035_s27 = sphi %s2149_s27, %s2593_s27   ;;  %s2031_s26 = sphi %s2147_s26, %s2592_s26   ;;  %s2027_s25 = sphi %s2145_s25, %s2591_s25  }
   0xc   : > { %2563 = sst [smem:[#allocation14_spill]] %s2031_s26  ;;  %s1534_s17 = sadd.s32 4294967294, %s2055_s15  }
   0xd   : > { %2564 = sst [smem:[#allocation15_spill]] %s2035_s27  ;;  %s37_s18 = sadd.s32 1, %s2047_s30 }
   0xe   : > { %2565 = sst [smem:[#allocation16_spill]] %s2047_s30  ;;  %s40_s19 = sadd.s32 1, %s2051_s14 }
   0xf   : > { %2566 = sst [smem:[#allocation17_spill]] %s2051_s14  ;;  %p38_p0 = scmp.ge.s32.totalorder %s37_s18, 2 }
  0x10   : > { %2567 = sst [smem:[#allocation18_spill]] %s2055_s15  ;;  %s327_s20 = sadd.s32 1, %s2035_s27 }
  0x11   : > { %p337_p1 = scmp.ne.s32.totalorder %s2035_s27, %s2031_s26  ;;  %p338_p2 = scmp.eq.s32.totalorder %s1533_s16, 3 }
  0x12   : > { %s2599_s18 = smov (%p38_p0, %s37_s18), 0  ;;  %s2601_s19 = smov (!%p38_p0, %s40_s19), %s2051_s14 }
  0x13   : > { %2568 = sst [smem:[#allocation19_spill]] %s2599_s18  ;;  %s323_s21 = ssub.s32 %s2047_s30, %s2599_s18 }
  0x14   : > { %p2197_p3 = por %p338_p2, %p337_p1  ;;  %p42_p4 = scmp.ge.s32.totalorder %s2601_s19, 2 }
  0x15   : > { %p343_p5 = scmp.ne.s32.totalorder %s2031_s26, %s2027_s25  ;;  %p344_p6 = scmp.eq.s32.totalorder %s1534_s17, 3 }
  0x16   : > { %s2569_s22 = scalar_select %p2197_p3, 1, 0 }
  0x17   : > { %p1535_p7 = scmp.ge.s32.totalorder %s2055_s15, 1  ;;  %s2603_s19 = smov (%p42_p4, %s2601_s19), 0 }
  0x18   : > { %2570 = sst [smem:[#allocation20_spill]] %s2569_s22  ;;  %p2206_p8 = por %p344_p6, %p343_p5 }
  0x19   : > { %2571 = sst [smem:[#allocation21_spill]] %s2603_s19  ;;  %p351_p9 = scmp.lt.s32.totalorder %s2055_s15, 5 }
  0x1a   : > { %s2572_s23 = scalar_select %p2206_p8, 1, 0 }
  0x1b   : > { %s322_s24 = ssub.s32 %s2051_s14, %s2603_s19  ;;  %p2213_p10 = pnand %p1535_p7, %p351_p9 }
  0x1c   : > { %2573 = sst [smem:[#allocation22_spill]] %s2572_s23  ;;  %s324_s13 = sor.u32 %s323_s21, %s322_s24 }
  0x1d   : > { %s2574_s18 = scalar_select %p2213_p10, 1, 0 }
  0x1e   : > { %p325_p11 = scmp.eq.s32.totalorder %s324_s13, 0  ;;  %p2217_p12 = scmp.eq.s32.totalorder %s1533_s16, 0 }
  0x1f   : > { %p1725_p13 = pneg %p2213_p10  ;;  %s2057_s21 = smov [#allocation6]  }
  0x20   : > { %s2575_s30 = scalar_select %p2217_p12, 1, 0 }
  0x21   : > { %s2224_s17 = scalar_select %p325_p11, %s2035_s27, %s327_s20  }
  0x22   : > { %p2228_p0 = pnand %p2217_p12, %p1725_p13  ;;  %s385_s24 = sshll.u32 %s2057_s21, 4  ;;  %s386_s24 = int_to_ptr.vmem [resolvable:$true] %s385_s24 }
  0x23   : > { %2576 = sst [smem:[#allocation23_spill]] %s2224_s17  ;;  %s1869_s16 = scalar_lea.hbm %s2533_s5, 256 }
  0x24   : > { %p1870_p1 = scmp.ne.s32.totalorder %s2533_s5, %s1869_s16  ;;  %p2240_p2 = pneg %p2228_p0 }
  0x25   : > { %p1876_p6 = scmp.lt.u32.totalorder %s1869_s16, %s2533_s5 }
  0x26   : > { %p1872_p4 = pnand %p2240_p2, %p1870_p1 }
  0x28   : > { %p1873_p5 = pneg %p1872_p4 }
  0x2a   : > { %p1878_p7 = pnand %p1876_p6, %p1873_p5 }
  0x2c   : > { %1881 = shalt.err (!%p1878_p7)
}
  0x2d   : > { %s1882_s19 = scalar_lea.vmem %s386_s24, 256  ;;  %p1890_p8 = scmp.lt.s32.totalorder %s386_s24, %s386_s24 }
  0x2e   : > { %p1883_p9 = scmp.ne.s32.totalorder %s386_s24, %s1882_s19  ;;  %p1891_p3 = scmp.lt.s32.totalorder %s1882_s19, %s1882_s19 }
  0x30   : > { %p1885_p11 = pnand %p1883_p9, %p2240_p2  ;;  %p1892_p12 = por %p1891_p3, %p1890_p8 }
  0x32   : > { %p1886_p13 = pneg %p1885_p11 }
  0x34   : > { %p1893_p10 = pnand %p1892_p12, %p1886_p13 }
  0x36   : > { %1896 = shalt.err (!%p1893_p10)
}
  0x37   : > { %s2058_s25 = smov 64   ;;  %s2059_s14 = smov 4  }
  0x38   : > { %1731 = dma.hbm_to_vmem [thread:$0]  (!%p2228_p0), %s2533_s5, 256, %s386_s24, [#allocation7], %s2058_s25, %s2058_s25, %s2059_s14  }
  0x39   : > { %s2060_s16 = smov [#allocation3]   ;;  %s2061_s27 = smov [#allocation8]  }
  0x3a   : > { %s369_s21 = sshll.u32 %s2060_s16, 4  ;;  %s401_s15 = sshll.u32 %s2061_s27, 4  ;;  %s370_s21 = int_to_ptr.vmem [resolvable:$true] %s369_s21  ;;  %s2259_s15 = int_to_ptr.vmem [resolvable:$true] %s401_s15 }
  0x3b   : > { %s1897_s12 = scalar_lea.hbm %s2531_s3, 256 }
  0x3c   : > { %p1898_p3 = scmp.ne.s32.totalorder %s2531_s3, %s1897_s12  ;;  %p1904_p12 = scmp.lt.u32.totalorder %s1897_s12, %s2531_s3 }
  0x3e   : > { %p1900_p8 = pnand %p1898_p3, %p2240_p2 }
  0x40   : > { %p1901_p10 = pneg %p1900_p8 }
  0x42   : > { %p1906_p1 = pnand %p1904_p12, %p1901_p10 }
  0x44   : > { %1909 = shalt.err (!%p1906_p1)
}
  0x45   : > { %s1910_s27 = scalar_lea.vmem %s370_s21, 256  ;;  %p1918_p7 = scmp.lt.s32.totalorder %s370_s21, %s370_s21 }
  0x46   : > { %p1911_p4 = scmp.ne.s32.totalorder %s370_s21, %s1910_s27  ;;  %p1919_p9 = scmp.lt.s32.totalorder %s1910_s27, %s1910_s27 }
  0x48   : > { %p1913_p5 = pnand %p1911_p4, %p2240_p2  ;;  %p1920_p11 = por %p1919_p9, %p1918_p7 }
  0x4a   : > { %p1914_p6 = pneg %p1913_p5 }
  0x4c   : > { %p1921_p13 = pnand %p1920_p11, %p1914_p6 }
  0x4e   : > { %1924 = shalt.err (!%p1921_p13)
}
  0x4f   : > { %1728 = dma.hbm_to_vmem [thread:$0]  (!%p2228_p0), %s2531_s3, 256, %s370_s21, [#allocation4], %s2058_s25, %s2058_s25, %s2059_s14  }
  0x50   : > { %s1925_s13 = scalar_lea.hbm %s2535_s7, 256 }
  0x51   : > { %p1926_p3 = scmp.ne.s32.totalorder %s2535_s7, %s1925_s13  ;;  %p1932_p12 = scmp.lt.u32.totalorder %s1925_s13, %s2535_s7 }
  0x53   : > { %p1928_p8 = pnand %p1926_p3, %p2240_p2 }
  0x55   : > { %p1929_p10 = pneg %p1928_p8 }
  0x57   : > { %p1934_p1 = pnand %p1932_p12, %p1929_p10 }
  0x59   : > { %1937 = shalt.err (!%p1934_p1)
}
  0x5a   : > { %s1938_s21 = scalar_lea.vmem %s2259_s15, 256  ;;  %p1946_p7 = scmp.lt.s32.totalorder %s2259_s15, %s2259_s15 }
  0x5b   : > { %p1939_p4 = scmp.ne.s32.totalorder %s2259_s15, %s1938_s21  ;;  %p1947_p9 = scmp.lt.s32.totalorder %s1938_s21, %s1938_s21 }
  0x5d   : > { %p1941_p5 = pnand %p1939_p4, %p2240_p2  ;;  %p1948_p11 = por %p1947_p9, %p1946_p7 }
  0x5f   : > { %p1942_p6 = pneg %p1941_p5 }
  0x61   : > { %p1949_p13 = pnand %p1948_p11, %p1942_p6 }
  0x63   : > { %1952 = shalt.err (!%p1949_p13)
}
  0x64   : > { %1734 = dma.hbm_to_vmem [thread:$0]  (!%p2228_p0), %s2535_s7, 256, %s2259_s15, [#allocation7], %s2058_s25, %s2058_s25, %s2059_s14  }
  0x65   : > { %p2579_p3 = scmp.ne.s32.totalorder %s2574_s18, 0 }
  0x66   : > { %p2580_p2 = scmp.ne.s32.totalorder (!%p2579_p3), %s2575_s30, 0 }
  0x67   : > { %440 = sbr.rel (%p2579_p3) target bundleno = 2837 (0xb15), region = 72 }
  0x6e   : > { %2014 = dma.done.wait (%p2580_p2), [#allocation4], 256  }
  0x6f   : > { %2016 = vsyncadd (%p2580_p2), [#allocation4], 4294967040 }
  0x70   : > { %2018 = dma.done.wait (%p2580_p2), [#allocation7], 512  }
  0x71   : > { %2020 = vsyncadd (%p2580_p2), [#allocation7], 4294966784  ;;  %p492_p0 = scmp.lt.s32.totalorder %s2043_s29, 1  ;;  %s1547_s18 = sshll.u32 %s2039_s28, 3  ;;  %vm503_vm0 = vcmask 261120   ;;  %v1827_v21 = vld [vmem:[%s2529_s1] sm:$0xff]  }
  0x72   : > { %v2062_v22 = vmov 0.0   ;;  %v1828_v23 = vld [vmem:[%s2529_s1 + $0x8] sm:$0xff]   ;;  %vm2063_vm1 = vmmov 0   ;;  %v1830_v39 = vld [vmem:[#allocation3 + $0x8] sm:$0xff]   ;;  %v1548_v43 = vld [vmem:[%s2530_s2] ss:$0 sm:$0xff] }
  0x73   : > { %s493_s15 = scalar_select %p492_p0, %s2043_s29, 1  ;;  %1619 = vmatprep.subr.bf16.mxu1 %v2062_v22  ;;  %1635 = vmatprep.subr.bf16.mxu0 %v2062_v22  ;;  %v1829_v35 = vld [vmem:[#allocation3] sm:$0xff]   ;;  %v1552_v50 = vld [vmem:[%s2532_s4] ss:$0 sm:$0xff]  ;;  %vm688_vm2 = vcmask 64512   ;;  %vm736_vm4 = vcmask 130048  }
  0x74   : > { %1620 = vmatpush3.bf16.msra.mxu1 %v1827_v21  ;;  %1623 = vmatprep.mubr.msk.bf16.mxu1 %vm2063_vm1, %v2062_v22  ;;  %s2064_s17 = smov 120   ;;  %s2065_s27 = smov 112   ;;  %vm911_vm5 = vcmask 130112   ;;  %vm1026_vm6 = vcmask 195712   ;;  %vm1141_vm7 = vcmask 261312   ;;  %vm1344_vm8 = vcmask 523264  }
  0x75   : > { %s1585_s23 = sshll.u32 %s493_s15, 4  ;;  %1621 = vmatprep.subr.bf16.mxu1 %v2062_v22  ;;  %1637 = vmatprep.mubr.msk.bf16.mxu0 %vm2063_vm1, %v2062_v22  ;;  %s2066_s10 = smov 104  }
  0x76   : > { %s496_s14 = scalar_lea.vmem %s2528_s0, %s1585_s23  ;;  %s2067_s15 = smov 88  }
  0x77   : > { %s499_s12 = scalar_lea.vmem %s496_s14, %s1547_s18  ;;  %v502_v1 = vld [vmem:[%s496_s14 + $0x8] sm:$0xff]  ;;  %v501_v2 = vld [vmem:[%s496_s14] sm:$0xff]  ;;  %s2069_s23 = smov 72  }
  0x78   : > { %v2326_v0 = vld [vmem:[%s499_s12] sm:$0xff]  ;;  %v522_v4 = vsel %vm503_vm0, %v502_v1, 0.0  ;;  %v519_v5 = vsel %vm503_vm0, %v501_v2, 0.0  ;;  %1622 = vmatpush3.bf16.msra.mxu1 %v1828_v23  ;;  %s2070_s20 = smov 96   ;;  %s2071_s25 = smov 8  }
  0x79   : > { %v504_v3 = vsel %vm503_vm0, %v2326_v0, 0.0  ;;  %523 = vadd.xlane.f32.xlu1 %v522_v4  ;;  %1627 = vmatprep.subr.bf16.mxu1 %v2062_v22  ;;  %s2072_s14 = smov 16   ;;  %s2073_s12 = smov 24  }
  0x7a   : > { %505 = vadd.xlane.f32.xlu0 %v504_v3  ;;  %s2583_s22 = sld [smem:[#allocation25_spill]]  ;;  %s2584_s16 = sld [smem:[#allocation20_spill]] }
  0x7e   : > { %520 = vadd.xlane.f32.xlu0 %v519_v5  ;;  %v679_v5 = vlaneseq }
  0x80   : > { %p2586_p10 = scmp.ne.s32.totalorder %s2584_s16, 0 }
 0x106   : > { %v524_v7 = vpop.xlane.xlu1 %523 }
 0x107   : > { %v506_v6 = vpop.xlane.xlu0 %505  ;;  %v526_v9 = vmul.f32 0.03125, %v524_v7  ;;  %v681_v7 = vstv %s1547_s18  ;;  %s2068_s18 = smov 80  }
 0x108   : > { %v508_v8 = vmul.f32 0.03125, %v506_v6  ;;  %v680_v6 = vshrl.u32 %v679_v5, 7 }
 0x109   : > { %v528_v11 = vsub.f32 %v502_v1, %v526_v9  ;;  %v684_v9 = vand.u32 127, %v679_v5 }
 0x10a   : > { %v509_v10 = vsub.f32 %v2326_v0, %v508_v8  ;;  %v682_v8 = vadd.s32 %v681_v7, %v680_v6 }
 0x10b   : > { %v521_v12 = vpop.xlane.xlu0 %520  ;;  %v530_v15 = vmul.f32 %v528_v11, %v528_v11 }
 0x10c   : > { %v525_v13 = vmul.f32 0.03125, %v521_v12  ;;  %v510_v14 = vmul.f32 %v509_v10, %v509_v10  ;;  %vm685_vm3 = vcmp.gt.s32.totalorder %v684_v9, %v682_v8 }
 0x10d   : > { %v534_v18 = vsel %vm503_vm0, %v530_v15, 0.0 }
 0x10e   : > { %v527_v16 = vsub.f32 %v501_v2, %v525_v13  ;;  %v511_v17 = vsel %vm503_vm0, %v510_v14, 0.0 }
 0x10f   : > { %512 = vadd.xlane.f32.xlu1 %v511_v17 }
 0x110   : > { %v529_v19 = vmul.f32 %v527_v16, %v527_v16 }
 0x112   : > { %v531_v20 = vsel %vm503_vm0, %v529_v19, 0.0 }
 0x113   : > { %535 = vadd.xlane.f32.xlu1 %v534_v18  ;;  %532 = vadd.xlane.f32.xlu0 %v531_v20 }
 0x19c   : > { %v513_v24 = vpop.xlane.xlu1 %512 }
 0x19d   : > { %v514_v25 = vmul.f32 0.03125, %v513_v24 }
 0x19f   : > { %v515_v26 = vadd.f32 1e-05, %v514_v25 }
 0x1a0   : > { %v536_v27 = vpop.xlane.xlu1 %535  ;;  %v533_v28 = vpop.xlane.xlu0 %532 }
 0x1a1   : > { %1839 = vrsqrt.f32 %v515_v26  ;;  %v538_v29 = vmul.f32 0.03125, %v536_v27  ;;  %v537_v30 = vmul.f32 0.03125, %v533_v28 }
 0x1a3   : > { %v540_v31 = vadd.f32 1e-05, %v538_v29  ;;  %v539_v32 = vadd.f32 1e-05, %v537_v30 }
 0x1a5   : > { %1841 = vrsqrt.f32 %v540_v31 }
 0x1a6   : > { %1843 = vrsqrt.f32 %v539_v32 }
 0x1ab   : > { %v1840_v33 = vpop.eup %1839 }
 0x1ac   : > { %v517_v34 = vmul.f32 %v1840_v33, %v509_v10 }
 0x1ae   : > { %v518_v36 = vpack.c.bf16 %v517_v34, %v517_v34 }
 0x1af   : > { %v1842_v37 = vpop.eup %1841 }
 0x1b0   : > { %v1844_v38 = vpop.eup %1843  ;;  %1624 = vmatmul.mubr.msk.bf16.vlgmr.msra.gmra.mrb[0].mxu1 %vm503_vm0, %v518_v36  ;;  %v544_v40 = vmul.f32 %v1842_v37, %v528_v11 }
 0x1b1   : > { %1628 = vmatpush3.bf16.msra.mxu1 %v1829_v35  ;;  %1631 = vmatprep.mubr.msk.bf16.mxu1 %vm2063_vm1, %v2062_v22  ;;  %v543_v41 = vmul.f32 %v1844_v38, %v527_v16 }
 0x1b2   : > { %1629 = vmatprep.subr.bf16.mxu1 %v2062_v22 }
 0x1b3   : > { %v545_v42 = vpack.c.bf16 %v544_v40, %v543_v41 }
 0x1b5   : > { %1630 = vmatpush3.bf16.msra.mxu1 %v1830_v39 }
 0x1b6   : > { %1641 = vmatprep.subr.bf16.mxu1 %v2062_v22 }
 0x1b8   : > { %1632 = vmatmul.mubr.msk.bf16.vlgmr.msra.gmra.mrb[4].mxu1 %vm503_vm0, %v545_v42 }
 0x1b9   : > { %1643 = vmatprep.mubr.msk.bf16.mxu1 %vm2063_vm1, %v2062_v22 }
 0x283   : > { %v606_v44 = vpop.f32.mrb[0].mxu1 }
 0x284   : > { %v607_v45 = vadd.f32 %v1548_v43, %v606_v44  ;;  %v1625_v46 = vpop.f32.mrb[1].mxu1 }
 0x285   : > { %v609_v47 = vpop.f32.mrb[2].mxu1 }
 0x286   : > { %v686_v48 = vpack.c.bf16 %v607_v45, %v607_v45  ;;  %v1626_v49 = vpop.f32.mrb[3].mxu1 }
 0x288   : > { %798 = vrot.lane.b32.xlu1 %v686_v48, %s2064_s17 }
 0x28b   : > { %v672_v51 = vpop.f32.mrb[4].mxu1 }
 0x28c   : > { %v1633_v52 = vpop.f32.mrb[5].mxu1  ;;  %v673_v54 = vadd.f32 %v1552_v50, %v672_v51 }
 0x28d   : > { %v675_v53 = vpop.f32.mrb[6].mxu1 }
 0x28e   : > { %v676_v55 = vadd.f32 %v1552_v50, %v675_v53  ;;  %v1634_v56 = vpop.f32.mrb[7].mxu1 }
 0x290   : > { %v2364_v57 = vpack.c.bf16 %v676_v55, %v673_v54 }
 0x292   : > { %915 = vrot.lane.b32.xlu1 %v2364_v57, %s2065_s27  ;;  %800 = vrot.lane.b32.xlu0 %v2364_v57, %s2064_s17  ;;  %v693_v58 = vsel %vm688_vm2, %v2364_v57, 0  ;;  %s1581_s17 = sshll.u32 %s2043_s29, 1 }
 0x293   : > { %1636 = vmatpush3.bf16.xpose.msra.mxu0 %v693_v58  ;;  %s1424_s24 = sadd.s32 %s2039_s28, %s1581_s17  ;;  %s2074_s28 = smov [#allocation9]  }
 0x294   : > { %1647 = vmatprep.subr.bf16.mxu0 %v2062_v22  ;;  %s1582_s21 = sshll.u32 %s1424_s24, 7 }
 0x296   : > { %913 = vrot.lane.b32.xlu1 %v686_v48, %s2065_s27  ;;  %1030 = vrot.lane.b32.xlu0 %v2364_v57, %s2066_s10 }
 0x29a   : > { %1028 = vrot.lane.b32.xlu1 %v686_v48, %s2066_s10  ;;  %1638 = vmatmul.mubr.msk.bf16.vlgmr.msra.gmra.mrb[0].mxu0 %vm688_vm2, %v686_v48 }
 0x29b   : > { %1649 = vmatprep.mubr.msk.bf16.mxu0 %vm2063_vm1, %v2062_v22 }
 0x2fa   : > { %v799_v61 = vpop.permute.xlu1 %798 }
 0x304   : > { %v801_v59 = vpop.permute.xlu0 %800  ;;  %v916_v62 = vpop.permute.xlu1 %915 }
 0x305   : > { %v806_v60 = vsel %vm688_vm2, %v801_v59, 0  ;;  %v921_v63 = vsel %vm688_vm2, %v916_v62, 0 }
 0x306   : > { %1648 = vmatpush3.bf16.xpose.msra.mxu0 %v806_v60 }
 0x307   : > { %1659 = vmatprep.subr.bf16.mxu0 %v2062_v22 }
 0x308   : > { %v1031_v1 = vpop.permute.xlu0 %1030  ;;  %v914_v2 = vpop.permute.xlu1 %913 }
 0x309   : > { %v1036_v3 = vsel %vm688_vm2, %v1031_v1, 0 }
 0x30c   : > { %v1029_v4 = vpop.permute.xlu1 %1028 }
 0x30d   : > { %1650 = vmatmul.mubr.msk.bf16.vlgmr.msra.gmra.mrb[4].mxu0 %vm688_vm2, %v799_v61 }
 0x30e   : > { %1660 = vmatpush3.bf16.xpose.msra.mxu0 %v921_v63  ;;  %1661 = vmatprep.mubr.msk.bf16.mxu0 %vm2063_vm1, %v2062_v22 }
 0x30f   : > { %1671 = vmatprep.subr.bf16.mxu0 %v2062_v22 }
 0x315   : > { %1662 = vmatmul.mubr.msk.bf16.vlgmr.msra.gmra.mrb[8].mxu0 %vm688_vm2, %v914_v2 }
 0x316   : > { %1672 = vmatpush3.bf16.xpose.msra.mxu0 %v1036_v3  ;;  %1673 = vmatprep.mubr.msk.bf16.mxu0 %vm2063_vm1, %v2062_v22 }
 0x317   : > { %1683 = vmatprep.subr.bf16.mxu0 %v2062_v22 }
 0x31d   : > { %1674 = vmatmul.mubr.msk.bf16.vlgmr.msra.gmra.mrb[12].mxu0 %vm688_vm2, %v1029_v4 }
 0x31e   : > { %1687 = vmatprep.mubr.msk.bf16.mxu0 %vm2063_vm1, %v2062_v22 }
 0x36d   : > { %v729_v10 = vpop.f32.mrb[0].mxu0 }
 0x36e   : > { %v735_v11 = vsel %vm685_vm3, -inf, %v729_v10  ;;  %v1639_v12 = vpop.f32.mrb[1].mxu0 }
 0x36f   : > { %v732_v13 = vpop.f32.mrb[2].mxu0  ;;  %v737_v14 = vsel %vm736_vm4, %v735_v11, -inf }
 0x370   : > { %738 = vmax.xlane.f32.xlu0 %v737_v14  ;;  %v1640_v15 = vpop.f32.mrb[3].mxu0 }
 0x3e0   : > { %v842_v16 = vpop.f32.mrb[4].mxu0 }
 0x3e1   : > { %v848_v17 = vsel %vm685_vm3, -inf, %v842_v16  ;;  %v1651_v18 = vpop.f32.mrb[5].mxu0  ;;  %v1831_v16 = vld [vmem:[#allocation6] sm:$0xff]  }
 0x3e2   : > { %v845_v19 = vpop.f32.mrb[6].mxu0  ;;  %v849_v20 = vsel %vm736_vm4, %v848_v17, -inf  ;;  %1684 = vmatpush3.bf16.msra.mxu0 %v1831_v16 }
 0x3e3   : > { %850 = vmax.xlane.f32.xlu1 %v849_v20  ;;  %v1652_v21 = vpop.f32.mrb[7].mxu0  ;;  %v1832_v19 = vld [vmem:[#allocation6 + $0x8] sm:$0xff]   ;;  %1685 = vmatprep.subr.bf16.mxu0 %v2062_v22 }
 0x3e6   : > { %1686 = vmatpush3.bf16.msra.mxu0 %v1832_v19 }
 0x3e7   : > { %1699 = vmatprep.subr.bf16.mxu0 %v2062_v22 }
 0x3e8   : > { %v957_v23 = vpop.f32.mrb[8].mxu0 }
 0x3e9   : > { %v963_v24 = vsel %vm685_vm3, -inf, %v957_v23  ;;  %v1663_v25 = vpop.f32.mrb[9].mxu0 }
 0x3ea   : > { %v960_v26 = vpop.f32.mrb[10].mxu0  ;;  %v964_v27 = vsel %vm736_vm4, %v963_v24, -inf }
 0x3eb   : > { %965 = vmax.xlane.f32.xlu0 %v964_v27  ;;  %v1664_v28 = vpop.f32.mrb[11].mxu0 }
 0x3f0   : > { %v1072_v29 = vpop.f32.mrb[12].mxu0 }
 0x3f1   : > { %v1078_v30 = vsel %vm685_vm3, -inf, %v1072_v29  ;;  %v1675_v31 = vpop.f32.mrb[13].mxu0 }
 0x3f2   : > { %v1075_v32 = vpop.f32.mrb[14].mxu0  ;;  %v1079_v33 = vsel %vm736_vm4, %v1078_v30, -inf }
 0x3f3   : > { %1080 = vmax.xlane.f32.xlu0 %v1079_v33  ;;  %v1676_v34 = vpop.f32.mrb[15].mxu0 }
 0x3f4   : > { %859 = vrot.lane.b32.xlu1 %v2364_v57, %s2067_s15 }
 0x3f8   : > { %974 = vrot.lane.b32.xlu1 %v2364_v57, %s2068_s18 }
 0x3fc   : > { %1089 = vrot.lane.b32.xlu1 %v2364_v57, %s2069_s23  ;;  %s2585_s23 = sld [smem:[#allocation26_spill]] }
 0x3fd   : > { %v739_v35 = vpop.xlane.xlu0 %738 }
 0x3fe   : > { %v740_v37 = vsub.f32 %v735_v11, %v739_v35 }
 0x400   : > { %v741_v40 = vmul.f32 1.442695, %v740_v37 }
 0x409   : > { %748 = vrot.lane.b32.xlu0 %v2364_v57, %s2070_s20  ;;  %s2474_s20 = scalar_lea.hbm %s2585_s23, %s1582_s21 }
 0x470   : > { %v851_v36 = vpop.xlane.xlu1 %850 }
 0x471   : > { %v852_v38 = vsub.f32 %v848_v17, %v851_v36  ;;  %v1564_v36 = vld [vmem:[%s2534_s6] ss:$0 sm:$0xff] }
 0x473   : > { %v853_v39 = vmul.f32 1.442695, %v852_v38 }
 0x474   : > { %v860_v53 = vpop.permute.xlu1 %859 }
 0x475   : > { %1845 = vpow2.f32 %v853_v39 }
 0x476   : > { %1847 = vpow2.f32 %v741_v40 }
 0x478   : > { %v966_v41 = vpop.xlane.xlu0 %965  ;;  %v975_v57 = vpop.permute.xlu1 %974 }
 0x479   : > { %v967_v42 = vsub.f32 %v963_v24, %v966_v41 }
 0x47b   : > { %v968_v43 = vmul.f32 1.442695, %v967_v42 }
 0x47c   : > { %v1090_v61 = vpop.permute.xlu1 %1089 }
 0x47d   : > { %1849 = vpow2.f32 %v968_v43 }
 0x47f   : > { %v1846_v44 = vpop.eup %1845 }
 0x480   : > { %v1081_v45 = vpop.xlane.xlu0 %1080  ;;  %v855_v46 = vsel %vm736_vm4, %v1846_v44, 0.0  ;;  %v1848_v48 = vpop.eup %1847  ;;  %v858_v55 = vpack.c.bf16 %v1846_v44, %v1846_v44 }
 0x481   : > { %v1082_v47 = vsub.f32 %v1078_v30, %v1081_v45  ;;  %856 = vadd.xlane.f32.xlu0 %v855_v46  ;;  %v746_v51 = vpack.c.bf16 %v1848_v48, %v1848_v48  ;;  %v743_v59 = vsel %vm736_vm4, %v1848_v48, 0.0  ;;  %v1568_v48 = vld [vmem:[%s2539_s11] ss:$0 sm:$0xff] }
 0x483   : > { %v1083_v49 = vmul.f32 1.442695, %v1082_v47 }
 0x484   : > { %v749_v50 = vpop.permute.xlu0 %748 }
 0x485   : > { %1851 = vpow2.f32 %v1083_v49  ;;  %1642 = vmatpush3.bf16.msra.mxu1 %v749_v50 }
 0x486   : > { %1653 = vmatprep.subr.bf16.mxu1 %v2062_v22 }
 0x487   : > { %v1850_v52 = vpop.eup %1849 }
 0x488   : > { %1644 = vmatmul.mubr.msk.bf16.vlgmr.msra.gmra.mrb[8].mxu1 %vm736_vm4, %v746_v51  ;;  %v970_v54 = vsel %vm736_vm4, %v1850_v52, 0.0  ;;  %v973_v60 = vpack.c.bf16 %v1850_v52, %v1850_v52 }
 0x489   : > { %971 = vadd.xlane.f32.xlu1 %v970_v54  ;;  %1654 = vmatpush3.bf16.msra.mxu1 %v860_v53  ;;  %v1833_v54 = vld [vmem:[#allocation8] sm:$0xff]  }
 0x48a   : > { %1655 = vmatprep.mubr.msk.bf16.mxu1 %vm2063_vm1, %v2062_v22  ;;  %1665 = vmatprep.subr.bf16.mxu1 %v2062_v22 }
 0x48f   : > { %v1852_v56 = vpop.eup %1851 }
 0x490   : > { %1656 = vmatmul.mubr.msk.bf16.vlgmr.msra.gmra.mrb[12].mxu1 %vm736_vm4, %v858_v55  ;;  %v1085_v58 = vsel %vm736_vm4, %v1852_v56, 0.0  ;;  %v1088_v62 = vpack.c.bf16 %v1852_v56, %v1852_v56  ;;  %v1834_v55 = vld [vmem:[#allocation8 + $0x8] sm:$0xff]   ;;  %v1835_v56 = vld [vmem:[%s2537_s9] sm:$0xff]  }
 0x491   : > { %1666 = vmatpush3.bf16.msra.mxu1 %v975_v57  ;;  %1086 = vadd.xlane.f32.xlu0 %v1085_v58  ;;  %v1836_v57 = vld [vmem:[%s2537_s9 + $0x8] sm:$0xff]  }
 0x492   : > { %1667 = vmatprep.mubr.msk.bf16.mxu1 %vm2063_vm1, %v2062_v22  ;;  %1677 = vmatprep.subr.bf16.mxu1 %v2062_v22 }
 0x495   : > { %744 = vadd.xlane.f32.xlu0 %v743_v59 }
 0x498   : > { %1668 = vmatmul.mubr.msk.bf16.vlgmr.msra.gmra.mrb[16].mxu1 %vm736_vm4, %v973_v60 }
 0x499   : > { %1678 = vmatpush3.bf16.msra.mxu1 %v1090_v61  ;;  %1679 = vmatprep.mubr.msk.bf16.mxu1 %vm2063_vm1, %v2062_v22 }
 0x49a   : > { %1691 = vmatprep.subr.bf16.mxu1 %v2062_v22 }
 0x4a0   : > { %1680 = vmatmul.mubr.msk.bf16.vlgmr.msra.gmra.mrb[20].mxu1 %vm736_vm4, %v1088_v62  ;;  %v1837_v62 = vld [vmem:[%s2537_s9 + $0x10] sm:$0xff]  }
 0x4a1   : > { %1695 = vmatprep.mubr.msk.bf16.mxu1 %vm2063_vm1, %v2062_v22  ;;  %1692 = vmatpush3.bf16.msra.mxu1 %v1833_v54 }
 0x4a2   : > { %1693 = vmatprep.subr.bf16.mxu1 %v2062_v22 }
 0x4a5   : > { %1694 = vmatpush3.bf16.msra.mxu1 %v1834_v55 }
 0x50e   : > { %v857_v63 = vpop.xlane.xlu0 %856 }
 0x516   : > { %v972_v8 = vpop.xlane.xlu1 %971 }
 0x51e   : > { %v1087_v1 = vpop.xlane.xlu0 %1086 }
 0x522   : > { %v745_v2 = vpop.xlane.xlu0 %744 }
 0x523   : > { %1853 = vrcp.f32 %v745_v2 }
 0x524   : > { %1855 = vrcp.f32 %v857_v63  ;;  %v1838_v63 = vld [vmem:[%s2537_s9 + $0x18] sm:$0xff]  }
 0x525   : > { %1857 = vrcp.f32 %v972_v8 }
 0x526   : > { %1859 = vrcp.f32 %v1087_v1  ;;  %v1569_v1 = vld [vmem:[%s2536_s8] ss:$0 sm:$0xff] }
 0x52d   : > { %v1854_v3 = vpop.eup %1853 }
 0x52e   : > { %v1856_v10 = vpop.eup %1855 }
 0x52f   : > { %v1858_v17 = vpop.eup %1857 }
 0x530   : > { %v1860_v25 = vpop.eup %1859 }
 0x55b   : > { %v788_v4 = vpop.f32.mrb[8].mxu1 }
 0x55c   : > { %v795_v5 = vmul.f32 %v1854_v3, %v788_v4  ;;  %v1645_v6 = vpop.f32.mrb[9].mxu1 }
 0x55d   : > { %v791_v7 = vpop.f32.mrb[10].mxu1 }
 0x55e   : > { %796 = vst.msk [vmem:[#allocation2] sm:$0xff] %vm688_vm2, %v795_v5  ;;  %v1646_v9 = vpop.f32.mrb[11].mxu1 }
 0x563   : > { %v899_v11 = vpop.f32.mrb[12].mxu1 }
 0x564   : > { %v906_v12 = vmul.f32 %v1856_v10, %v899_v11  ;;  %v1657_v13 = vpop.f32.mrb[13].mxu1 }
 0x565   : > { %v902_v14 = vpop.f32.mrb[14].mxu1 }
 0x566   : > { %908 = vrot.lane.b32.xlu0 %v906_v12, %s2071_s25  ;;  %v1658_v15 = vpop.f32.mrb[15].mxu1 }
 0x56b   : > { %v1014_v18 = vpop.f32.mrb[16].mxu1 }
 0x56c   : > { %v1021_v20 = vmul.f32 %v1858_v17, %v1014_v18  ;;  %v1669_v21 = vpop.f32.mrb[17].mxu1 }
 0x56d   : > { %v1017_v23 = vpop.f32.mrb[18].mxu1 }
 0x56e   : > { %1023 = vrot.lane.b32.xlu1 %v1021_v20, %s2072_s14  ;;  %v1670_v24 = vpop.f32.mrb[19].mxu1  ;;  %s2581_s14 = sld [smem:[#allocation24_spill]]  ;;  %v1579_v20 = vld [vmem:[%s2583_s22] ss:$0 sm:$0xff] }
 0x573   : > { %v1129_v26 = vpop.f32.mrb[20].mxu1 }
 0x574   : > { %v1136_v27 = vmul.f32 %v1860_v25, %v1129_v26  ;;  %v1681_v28 = vpop.f32.mrb[21].mxu1 }
 0x575   : > { %v1132_v29 = vpop.f32.mrb[22].mxu1 }
 0x576   : > { %1138 = vrot.lane.b32.xlu1 %v1136_v27, %s2073_s12  ;;  %v1682_v30 = vpop.f32.mrb[23].mxu1  ;;  %s2582_s12 = sld [smem:[#allocation14_spill]] }
 0x57c   : > { %s489_s13 = sand.u32 1, %s2582_s12  }
 0x57d   : > { %s1544_s19 = sshll.u32 %s489_s13, 3  ;;  %s1413_s25 = scalar_lea.sflag [#allocation5], %s489_s13 }
 0x57e   : > { %s491_s27 = scalar_lea.vmem [#allocation9], %s1544_s19 }
 0x57f   : > { %s1428_s10 = sshll.u32 %s491_s27, 4  ;;  %s2476_s10 = int_to_ptr.vmem [resolvable:$true] %s1428_s10 }
 0x580   : > { %s1953_s29 = scalar_lea.vmem %s2476_s10, 128 }
 0x581   : > { %p1954_p8 = scmp.ne.s32.totalorder %s2476_s10, %s1953_s29 }
 0x583   : > { %p1955_p12 = pnand %p1954_p8, %p2586_p10 }
 0x585   : > { %p1956_p1 = pneg %p1955_p12 }
 0x5d8   : > { %v909_v31 = vpop.permute.xlu0 %908 }
 0x5d9   : > { %912 = vst.msk [vmem:[#allocation2] sm:$0xff] %vm911_vm5, %v909_v31 }
 0x5e0   : > { %v1024_v32 = vpop.permute.xlu1 %1023 }
 0x5e1   : > { %1027 = vst.msk [vmem:[#allocation2] sm:$0xff] %vm1026_vm6, %v1024_v32 }
 0x5e8   : > { %v1139_v33 = vpop.permute.xlu1 %1138 }
 0x5e9   : > { %1142 = vst.msk [vmem:[#allocation2] sm:$0xff] %vm1141_vm7, %v1139_v33 }
 0x5f0   : > { %v1143_v34 = vld [vmem:[#allocation2] sm:$0xff] }
 0x5f1   : > { %v1144_v35 = vpack.c.bf16 %v1143_v34, %v1143_v34 }
 0x5f3   : > { %1688 = vmatmul.mubr.msk.bf16.vlgmr.msra.gmra.mrb[16].mxu0 %vm503_vm0, %v1144_v35 }
 0x5f4   : > { %1707 = vmatprep.mubr.msk.bf16.mxu0 %vm2063_vm1, %v2062_v22  ;;  %1700 = vmatpush3.bf16.msra.mxu0 %v1835_v56 }
 0x5f5   : > { %1701 = vmatprep.subr.bf16.mxu0 %v2062_v22 }
 0x5f8   : > { %1702 = vmatpush3.bf16.msra.mxu0 %v1836_v57 }
 0x5f9   : > { %1703 = vmatprep.subr.bf16.mxu0 %v2062_v22 }
 0x5fc   : > { %1704 = vmatpush3.bf16.msra.mxu0 %v1837_v62 }
 0x5fd   : > { %1705 = vmatprep.subr.bf16.mxu0 %v2062_v22  ;;  %v1573_v22 = vld [vmem:[%s2581_s14] ss:$0 sm:$0xff]  ;;  %s1957_s14 = sshll.u32 %s2074_s28, 4  ;;  %s1958_s14 = int_to_ptr.vmem [resolvable:$false] %s1957_s14 }
 0x5fe   : > { %s1959_s12 = scalar_lea.vmem %s1958_s14, 256  ;;  %p1960_p4 = scmp.lt.s32.totalorder %s2476_s10, %s1958_s14 }
 0x5ff   : > { %p1961_p5 = scmp.lt.s32.totalorder %s1959_s12, %s1953_s29 }
 0x600   : > { %1706 = vmatpush3.bf16.msra.mxu0 %v1838_v63 }
 0x601   : > { %p1962_p6 = por %p1961_p5, %p1960_p4 }
 0x603   : > { %p1963_p7 = pnand %p1962_p6, %p1956_p1 }
 0x6c6   : > { %v1205_v37 = vpop.f32.mrb[16].mxu0 }
 0x6c7   : > { %v1206_v38 = vadd.f32 %v1564_v36, %v1205_v37  ;;  %v1689_v39 = vpop.f32.mrb[17].mxu0 }
 0x6c8   : > { %v1208_v40 = vpop.f32.mrb[18].mxu0 }
 0x6c9   : > { %v1690_v41 = vpop.f32.mrb[19].mxu0  ;;  %v1213_v42 = vmul.f32 %v1206_v38, %v1206_v38 }
 0x6cb   : > { %v1214_v43 = vsel %vm503_vm0, %v1213_v42, 0.0 }
 0x6cc   : > { %1215 = vadd.xlane.f32.xlu1 %v1214_v43 }
 0x759   : > { %v1216_v44 = vpop.xlane.xlu1 %1215 }
 0x75a   : > { %v1217_v45 = vadd.f32 1e-12, %v1216_v44 }
 0x75c   : > { %1861 = vrsqrt.f32 %v1217_v45 }
 0x766   : > { %v1862_v46 = vpop.eup %1861 }
 0x767   : > { %v1219_v47 = vmul.f32 %v1862_v46, %v1206_v38 }
 0x769   : > { %v1220_v49 = vsub.f32 %v1219_v47, %v2326_v0 }
 0x76b   : > { %v1227_v50 = vmul.f32 %v1568_v48, %v1220_v49 }
 0x76d   : > { %v1228_v51 = vadd.f32 %v1227_v50, %v2326_v0 }
 0x76f   : > { %v1229_v52 = vmul.f32 %v1228_v51, %v1228_v51 }
 0x771   : > { %v1230_v53 = vsel %vm503_vm0, %v1229_v52, 0.0 }
 0x772   : > { %1231 = vadd.xlane.f32.xlu0 %v1230_v53 }
 0x7ff   : > { %v1232_v0 = vpop.xlane.xlu0 %1231 }
 0x800   : > { %v1233_v58 = vadd.f32 1e-12, %v1232_v0 }
 0x802   : > { %1863 = vrsqrt.f32 %v1233_v58 }
 0x80c   : > { %v1864_v59 = vpop.eup %1863 }
 0x80d   : > { %v1235_v60 = vmul.f32 %v1864_v59, %v1228_v51 }
 0x80f   : > { %v1236_v61 = vpack.c.bf16 %v1235_v60, %v1235_v60 }
 0x811   : > { %1696 = vmatmul.mubr.msk.bf16.vlgmr.msra.gmra.mrb[24].mxu1 %vm503_vm0, %v1236_v61 }
 0x8e4   : > { %v1297_v2 = vpop.f32.mrb[24].mxu1 }
 0x8e5   : > { %v1298_v3 = vadd.f32 %v1569_v1, %v1297_v2  ;;  %v1697_v4 = vpop.f32.mrb[25].mxu1 }
 0x8e6   : > { %v1300_v5 = vpop.f32.mrb[26].mxu1 }
 0x8e7   : > { %v1303_v6 = vmax.f32 %v1298_v3, 0.0  ;;  %v1698_v7 = vpop.f32.mrb[27].mxu1 }
 0x8e9   : > { %v1304_v8 = vpack.c.bf16 %v1303_v6, %v1303_v6 }
 0x8eb   : > { %1708 = vmatmul.mubr.msk.bf16.vlgmr.msra.gmra.mrb[20].mxu0 %vm1344_vm8, %v1304_v8 }
 0x9be   : > { %v1382_v9 = vpop.f32.mrb[20].mxu0 }
 0x9bf   : > { %v1383_v10 = vadd.f32 %v1573_v22, %v1382_v9  ;;  %v1709_v11 = vpop.f32.mrb[21].mxu0 }
 0x9c0   : > { %v1385_v12 = vpop.f32.mrb[22].mxu0 }
 0x9c1   : > { %v1710_v13 = vpop.f32.mrb[23].mxu0  ;;  %v1388_v14 = vmul.f32 %v1383_v10, %v1383_v10 }
 0x9c3   : > { %v1389_v15 = vsel %vm503_vm0, %v1388_v14, 0.0 }
 0x9c4   : > { %1390 = vadd.xlane.f32.xlu0 %v1389_v15 }
 0xa51   : > { %v1391_v16 = vpop.xlane.xlu0 %1390 }
 0xa52   : > { %v1392_v17 = vadd.f32 1e-12, %v1391_v16 }
 0xa54   : > { %1865 = vrsqrt.f32 %v1392_v17 }
 0xa5e   : > { %v1866_v18 = vpop.eup %1865 }
 0xa5f   : > { %v1394_v19 = vmul.f32 %v1866_v18, %v1383_v10 }
 0xa61   : > { %v1395_v21 = vsub.f32 %v1394_v19, %v1235_v60 }
 0xa63   : > { %v1402_v23 = vmul.f32 %v1579_v20, %v1395_v21 }
 0xa65   : > { %v1403_v24 = vadd.f32 %v1402_v23, %v1235_v60 }
 0xa67   : > { %v1404_v25 = vmul.f32 %v1403_v24, %v1403_v24 }
 0xa69   : > { %v1405_v26 = vsel %vm503_vm0, %v1404_v25, 0.0 }
 0xa6a   : > { %1406 = vadd.xlane.f32.xlu0 %v1405_v26 }
 0xaf7   : > { %v1407_v27 = vpop.xlane.xlu0 %1406 }
 0xaf8   : > { %v1408_v28 = vadd.f32 1e-12, %v1407_v27 }
 0xafa   : > { %1867 = vrsqrt.f32 %v1408_v28 }
 0xb04   : > { %v1868_v29 = vpop.eup %1867 }
 0xb05   : > { %v1410_v30 = vmul.f32 %v1868_v29, %v1403_v24 }
 0xb07   : > { %1411 = vst.msk [vmem:[%s491_s27] sm:$0xff] %vm503_vm0, %v1410_v30 }
 0xb08   : > { %1966 = shalt.err (!%p1963_p7)
}
 0xb09   : > { %s1967_s30 = scalar_lea.hbm %s2474_s20, 128  ;;  %s1971_s13 = scalar_lea.hbm %s2585_s23, 512 }
 0xb0a   : > { %p1968_p9 = scmp.ne.s32.totalorder %s2474_s20, %s1967_s30  ;;  %p1972_p3 = scmp.lt.u32.totalorder %s2474_s20, %s2585_s23 }
 0xb0b   : > { %p1973_p2 = scmp.lt.u32.totalorder %s1971_s13, %s1967_s30  ;;  %p1975_p8 = scmp.lt.u32.totalorder %s1967_s30, %s2474_s20 }
 0xb0c   : > { %p1969_p11 = pnand %p1968_p9, %p2586_p10 }
 0xb0d   : > { %p1974_p0 = por %p1973_p2, %p1972_p3 }
 0xb0e   : > { %p1970_p13 = pneg %p1969_p11 }
 0xb0f   : > { %p1976_p12 = por %p1975_p8, %p1974_p0 }
 0xb11   : > { %p1977_p1 = pnand %p1976_p12, %p1970_p13 }
 0xb13   : > { %1980 = shalt.err (!%p1977_p1)
}
 0xb14   : > { %1723 = dma.vmem_to_hbm [thread:$0]  (%p2586_p10), %s2476_s10, 128, %s2474_s20, %s1413_s25  }
 0xb15 PF: > { %s2587_s24 = sld [smem:[#allocation18_spill]]  ;;  %s2588_s21 = sld [smem:[#allocation13_spill]] }
 0xb16   : > { %s2589_s27 = sld [smem:[#allocation22_spill]] }
 0xb1b   : > { %p1745_p4 = scmp.ge.s32.totalorder %s2587_s24, 2  ;;  %s1440_s15 = sand.u32 1, %s2588_s21  }
 0xb1c   : > { %p2590_p5 = scmp.ne.s32.totalorder %s2589_s27, 0  ;;  %s1441_s18 = scalar_lea.sflag [#allocation5], %s1440_s15 }
 0xb1e   : > { %p1736_p6 = pnand %p1745_p4, %p2590_p5 }
 0xb20   : > { %2022 = dma.done.wait (!%p1736_p6), %s1441_s18, 128  }
 0xb21   : > { %2024 = vsyncadd (!%p1736_p6), %s1441_s18, 4294967168  ;;  %s28_s15 = sadd.s32 1, %s2587_s24   ;;  %s2591_s25 = sld [smem:[#allocation14_spill]] }
 0xb22   : > { %p25_p7 = scmp.ge.s32.totalorder %s28_s15, 6   ;;  %s2592_s26 = sld [smem:[#allocation15_spill]] }
 0xb23   : > { %s2593_s27 = sld [smem:[#allocation23_spill]]  ;;  %s2594_s28 = sld [smem:[#allocation16_spill]] }
 0xb24   : > { %s2595_s29 = sld [smem:[#allocation17_spill]]  ;;  %s2596_s30 = sld [smem:[#allocation19_spill]] }
 0xb25   : > { %s2597_s14 = sld [smem:[#allocation21_spill]]  ;;  %27 = sbr.rel (!%p25_p7) target bundleno = 11 (0xb), region = 121 }
 0xb2c   :  { %1446 = vsyncpa [#allocation4], 1 }
 0xb2d   :  { %1448 = vsyncpa [#allocation4 + $0x1], 1 }
 0xb2e   :  { %1449 = vsyncpa [#allocation7], 1 }
 0xb2f   :  { %1450 = vsyncpa [#allocation5], 1 }
 0xb30   :  { %1452 = vsyncpa [#allocation5 + $0x1], 1 }

</bundles_post_ra>
